<compile_context>
chip_gen: v6e
topology: v6e:2x2x1
jax: 0.10.0
libtpu: 0.0.40
codegen_flags: <defaults>
</compile_context>

<pallas_src>
import numpy as np
import jax
import jax.numpy as jnp
from jax.experimental import pallas as pl
from jax.experimental.pallas import tpu as pltpu


def lstm_dueling_kernel(x_ref, wih_ref, whh_ref, b_ref,
                        hw1_ref, hb1_ref, w2_ref, b2_ref,
                        q_ref):
    BT = q_ref.shape[0]                 # batch-block size (M dim of the recurrence)
    H = whh_ref.shape[0]
    seq = x_ref.shape[0] // BT          # x_ref rows are laid out as t*BT + b_local
    wdt = wih_ref.dtype                 # weight dtype (bf16); activations stay f32

    # ---- Hoisted input projection for the whole block: one (seq*BT, 4H) matmul.
    # Kept as a value (a few vregs), not a VMEM scratch slab.
    pre = (jnp.dot(x_ref[...].astype(wdt), wih_ref[...],
                   preferred_element_type=jnp.float32)
           + b_ref[...])                                           # (seq*BT, 4H) f32

    # ---- LSTM recurrence, statically unrolled (seq is a small compile-time constant).
    # For seq >> 16-32, switch to lax.fori_loop(..., unroll=4/8) to bound live ranges.
    h = jnp.zeros((BT, H), jnp.float32)
    c = jnp.zeros((BT, H), jnp.float32)
    for t in range(seq):
        gates = (pre[t * BT:(t + 1) * BT, :]                       # sublane-contiguous
                 + jnp.dot(h.astype(wdt), whh_ref[...],
                           preferred_element_type=jnp.float32))    # (BT, 4H) f32
        # PyTorch LSTM gate order: input, forget, cell(g), output
        i = jax.nn.sigmoid(gates[:, 0:H])
        f = jax.nn.sigmoid(gates[:, H:2 * H])
        g = jnp.tanh(gates[:, 2 * H:3 * H])
        o = jax.nn.sigmoid(gates[:, 3 * H:4 * H])
        c = f * c + i * g
        h = o * jnp.tanh(c)
    h_last = h                                                     # out[:, -1, :]

    # ---- Fused dueling heads.
    # First layers: [v_fc1 | a_fc1] concatenated -> one (BT, 256) activation.
    hid = jnp.maximum(
        jnp.dot(h_last.astype(wdt), hw1_ref[...],
                preferred_element_type=jnp.float32) + hb1_ref[...],
        0.0)                                                       # (BT, 256)
    # Second layers: block-diagonal [v_fc2 (+) a_fc2] -> single matmul gives [v | a].
    va = (jnp.dot(hid.astype(wdt), w2_ref[...],
                  preferred_element_type=jnp.float32)
          + b2_ref[...])                                           # (BT, 1+out)
    v = va[:, 0:1]
    a = va[:, 1:]
    # q = v + (a - a.mean(dim=1, keepdim=True))
    q_ref[...] = v + (a - jnp.mean(a, axis=1, keepdims=True))


def neural_network_forward(x, params, batch_tile=8):
    """x: (B, seq, input_size) — B independent sequences; each row of the result is
    exactly one forward pass of the PyTorch module (which unsqueezes to batch 1)."""
    B, seq, input_size = x.shape
    H = params["whh"].shape[0]
    out_size = params["w2"].shape[1] - 1
    assert H % 128 == 0, "hidden_dim must be lane-aligned (multiple of 128)"
    BT = min(batch_tile, B)
    assert B % BT == 0, "batch must be divisible by batch_tile"
    nb = B // BT

    # Arrange each block time-major: row index inside a block = t*BT + b_local, so
    # the per-step gate slice pre[t*BT:(t+1)*BT] is sublane-contiguous in the kernel.
    xb = (x.reshape(nb, BT, seq, input_size)
           .transpose(0, 2, 1, 3)
           .reshape(nb, seq * BT, input_size))

    return pl.pallas_call(
        lstm_dueling_kernel,
        out_shape=jax.ShapeDtypeStruct((B, out_size), jnp.float32),
        grid=(nb,),
        in_specs=[
            pl.BlockSpec((None, seq * BT, input_size), lambda i: (i, 0, 0)),  # x block
            pl.BlockSpec((input_size, 4 * H), lambda i: (0, 0)),              # W_ih
            pl.BlockSpec((H, 4 * H), lambda i: (0, 0)),                       # W_hh
            pl.BlockSpec((1, 4 * H), lambda i: (0, 0)),                       # b_ih+b_hh
            pl.BlockSpec((H, 256), lambda i: (0, 0)),                         # fused fc1
            pl.BlockSpec((1, 256), lambda i: (0, 0)),
            pl.BlockSpec((256, 1 + out_size), lambda i: (0, 0)),              # fused fc2
            pl.BlockSpec((1, 1 + out_size), lambda i: (0, 0)),
        ],
        out_specs=pl.BlockSpec((BT, out_size), lambda i: (i, 0)),
        compiler_params=pltpu.CompilerParams(
            dimension_semantics=("parallel",)),   # shard batch blocks across TCs (v7x)
    )(xb, params["wih"], params["whh"], params["b"],
      params["hw1"], params["hb1"], params["w2"], params["b2"])


def init_params(key, input_size, output_size, hidden_dim):
    """Deterministic synthetic parameters (PyTorch-style uniform fan-in init),
    stored pre-transposed to (in_features, out_features), in float32."""
    ks = jax.random.split(key, 12)
    k_lstm = 1.0 / np.sqrt(hidden_dim)
    k_h = 1.0 / np.sqrt(hidden_dim)
    k_128 = 1.0 / np.sqrt(128.0)

    def u(k, shape, scale):
        return jax.random.uniform(k, shape, jnp.float32, -scale, scale)

    wih = u(ks[0], (input_size, 4 * hidden_dim), k_lstm)
    whh = u(ks[1], (hidden_dim, 4 * hidden_dim), k_lstm)
    b_ih = u(ks[2], (1, 4 * hidden_dim), k_lstm)
    b_hh = u(ks[3], (1, 4 * hidden_dim), k_lstm)

    return dict(
        wih=wih, whh=whh, b=b_ih + b_hh,
        vw1=u(ks[4], (hidden_dim, 128), k_h), vb1=u(ks[5], (1, 128), k_h),
        vw2=u(ks[6], (128, 1), k_128),        vb2=u(ks[7], (1, 1), k_128),
        aw1=u(ks[8], (hidden_dim, 128), k_h), ab1=u(ks[9], (1, 128), k_h),
        aw2=u(ks[10], (128, output_size), k_128), ab2=u(ks[11], (1, output_size), k_128),
    )


def fuse_params(p, weight_dtype=jnp.bfloat16):
    """Fuse the two dueling heads and cast weight matrices to bf16 (biases stay f32)."""
    out_size = p["aw2"].shape[1]
    hw1 = jnp.concatenate([p["vw1"], p["aw1"]], axis=1)              # (H, 256)
    hb1 = jnp.concatenate([p["vb1"], p["ab1"]], axis=1)              # (1, 256)
    w2 = jnp.zeros((256, 1 + out_size), jnp.float32)
    w2 = w2.at[:128, 0:1].set(p["vw2"]).at[128:, 1:].set(p["aw2"])   # block-diagonal
    b2 = jnp.concatenate([p["vb2"], p["ab2"]], axis=1)               # (1, 1+out)
    return dict(
        wih=p["wih"].astype(weight_dtype),
        whh=p["whh"].astype(weight_dtype),
        b=p["b"].astype(jnp.float32),
        hw1=hw1.astype(weight_dtype), hb1=hb1.astype(jnp.float32),
        w2=w2.astype(weight_dtype),   b2=b2.astype(jnp.float32),
    )


def reference_forward(x, p, weight_dtype=jnp.bfloat16):
    """Pure-JAX reference mirroring the PyTorch forward (unfused heads), batched over
    independent sequences, using the same bf16-weight / f32-accumulate numerics."""
    B, seq, _ = x.shape
    H = p["whh"].shape[0]
    wih = p["wih"].astype(weight_dtype)
    whh = p["whh"].astype(weight_dtype)
    h = jnp.zeros((B, H), jnp.float32)
    c = jnp.zeros((B, H), jnp.float32)
    for t in range(seq):
        g = (jnp.dot(x[:, t, :].astype(weight_dtype), wih,
                     preferred_element_type=jnp.float32) + p["b"]
             + jnp.dot(h.astype(weight_dtype), whh,
                       preferred_element_type=jnp.float32))
        i = jax.nn.sigmoid(g[:, 0:H])
        f = jax.nn.sigmoid(g[:, H:2 * H])
        gg = jnp.tanh(g[:, 2 * H:3 * H])
        o = jax.nn.sigmoid(g[:, 3 * H:4 * H])
        c = f * c + i * gg
        h = o * jnp.tanh(c)
    hb = h.astype(weight_dtype)
    v_hid = jnp.maximum(jnp.dot(hb, p["vw1"].astype(weight_dtype),
                                preferred_element_type=jnp.float32) + p["vb1"], 0.0)
    v = jnp.dot(v_hid.astype(weight_dtype), p["vw2"].astype(weight_dtype),
                preferred_element_type=jnp.float32) + p["vb2"]
    a_hid = jnp.maximum(jnp.dot(hb, p["aw1"].astype(weight_dtype),
                                preferred_element_type=jnp.float32) + p["ab1"], 0.0)
    a = jnp.dot(a_hid.astype(weight_dtype), p["aw2"].astype(weight_dtype),
                preferred_element_type=jnp.float32) + p["ab2"]
    return v + (a - jnp.mean(a, axis=1, keepdims=True))


if __name__ == "__main__":
    input_size = 16
    output_size = 8
    hidden_dim = 128    # lane-aligned stand-in for the default 256 (must be mult. of 128)
    seq_len = 8
    batch = 16          # independent sequences stacked into the MXU M dimension

    key = jax.random.PRNGKey(0)
    k_x, k_p = jax.random.split(key)
    x = jax.random.normal(k_x, (batch, seq_len, input_size), jnp.float32)

    raw_params = init_params(k_p, input_size, output_size, hidden_dim)
    params = fuse_params(raw_params)

    q = neural_network_forward(x, params, batch_tile=8)
    q = jax.block_until_ready(q)

    q_ref = reference_forward(x, raw_params)
    np.testing.assert_allclose(np.asarray(q), np.asarray(q_ref), rtol=2e-2, atol=2e-2)

    assert q.shape == (batch, output_size)
    print("KERNEL_OK")
</pallas_src>

<mosaic_0001>
module attributes {stable_mosaic.version = 11 : i64} {
  func.func @lstm_dueling_kernel(%arg0: i32, %arg1: memref<1x64x16xf32, #tpu.memory_space<vmem>>, %arg2: memref<16x512xbf16, #tpu.memory_space<vmem>>, %arg3: memref<128x512xbf16, #tpu.memory_space<vmem>>, %arg4: memref<1x512xf32, #tpu.memory_space<vmem>>, %arg5: memref<128x256xbf16, #tpu.memory_space<vmem>>, %arg6: memref<1x256xf32, #tpu.memory_space<vmem>>, %arg7: memref<256x9xbf16, #tpu.memory_space<vmem>>, %arg8: memref<1x9xf32, #tpu.memory_space<vmem>>, %arg9: memref<8x8xf32, #tpu.memory_space<vmem>>) attributes {dimension_semantics = [#tpu.dimension_semantics<parallel>], iteration_bounds = array<i64: 2>, scalar_prefetch = 0 : i64, scratch_operands = 0 : i64, tpu.core_type = #tpu.core_type<tc>, window_params = [{transform_indices = @transform_0, window_bounds = array<i64: 1, 64, 16>}, {pipeline_mode = #tpu.pipeline_mode<synchronous>, transform_indices = @transform_1, window_bounds = array<i64: 16, 512>}, {pipeline_mode = #tpu.pipeline_mode<synchronous>, transform_indices = @transform_2, window_bounds = array<i64: 128, 512>}, {pipeline_mode = #tpu.pipeline_mode<synchronous>, transform_indices = @transform_3, window_bounds = array<i64: 1, 512>}, {pipeline_mode = #tpu.pipeline_mode<synchronous>, transform_indices = @transform_4, window_bounds = array<i64: 128, 256>}, {pipeline_mode = #tpu.pipeline_mode<synchronous>, transform_indices = @transform_5, window_bounds = array<i64: 1, 256>}, {pipeline_mode = #tpu.pipeline_mode<synchronous>, transform_indices = @transform_6, window_bounds = array<i64: 256, 9>}, {pipeline_mode = #tpu.pipeline_mode<synchronous>, transform_indices = @transform_7, window_bounds = array<i64: 1, 9>}, {transform_indices = @transform_8, window_bounds = array<i64: 8, 8>}]} {
    %c0 = arith.constant 0 : index
    %c0_0 = arith.constant 0 : index
    %c0_1 = arith.constant 0 : index
    %0 = vector.load %arg1[%c0, %c0_0, %c0_1] : memref<1x64x16xf32, #tpu.memory_space<vmem>>, vector<1x64x16xf32>
    %1 = vector.shape_cast %0 : vector<1x64x16xf32> to vector<64x16xf32>
    %2 = arith.truncf %1 : vector<64x16xf32> to vector<64x16xbf16>
    %c0_2 = arith.constant 0 : index
    %c0_3 = arith.constant 0 : index
    %3 = vector.load %arg2[%c0_2, %c0_3] : memref<16x512xbf16, #tpu.memory_space<vmem>>, vector<16x512xbf16>
    %cst = arith.constant dense<0.000000e+00> : vector<64x512xf32>
    %4 = tpu.matmul %2, %3, %cst {dimension_numbers = #tpu.dot_dimension_numbers<[1], [0], [0], [1], [0, 0, 1, 1], [], []>} : vector<64x16xbf16>, vector<16x512xbf16>, vector<64x512xf32> -> vector<64x512xf32>
    %c0_4 = arith.constant 0 : index
    %c0_5 = arith.constant 0 : index
    %5 = vector.load %arg4[%c0_4, %c0_5] : memref<1x512xf32, #tpu.memory_space<vmem>>, vector<1x512xf32>
    %6 = vector.broadcast %5 : vector<1x512xf32> to vector<64x512xf32>
    %7 = arith.addf %4, %6 : vector<64x512xf32>
    %cst_6 = arith.constant 0.000000e+00 : f32
    %8 = vector.broadcast %cst_6 : f32 to vector<8x128xf32>
    %cst_7 = arith.constant 0.000000e+00 : f32
    %9 = vector.broadcast %cst_7 : f32 to vector<8x128xf32>
    %10 = vector.extract_strided_slice %7 {offsets = [0, 0], sizes = [8, 512], strides = [1, 1]} : vector<64x512xf32> to vector<8x512xf32>
    %11 = arith.truncf %8 : vector<8x128xf32> to vector<8x128xbf16>
    %c0_8 = arith.constant 0 : index
    %c0_9 = arith.constant 0 : index
    %12 = vector.load %arg3[%c0_8, %c0_9] : memref<128x512xbf16, #tpu.memory_space<vmem>>, vector<128x512xbf16>
    %cst_10 = arith.constant dense<0.000000e+00> : vector<8x512xf32>
    %13 = tpu.matmul %11, %12, %cst_10 {dimension_numbers = #tpu.dot_dimension_numbers<[1], [0], [0], [1], [0, 0, 1, 1], [], []>} : vector<8x128xbf16>, vector<128x512xbf16>, vector<8x512xf32> -> vector<8x512xf32>
    %14 = arith.addf %10, %13 : vector<8x512xf32>
    %15 = vector.extract_strided_slice %14 {offsets = [0, 0], sizes = [8, 128], strides = [1, 1]} : vector<8x512xf32> to vector<8x128xf32>
    %16 = arith.negf %15 : vector<8x128xf32>
    %17 = math.exp %16 : vector<8x128xf32>
    %cst_11 = arith.constant 1.000000e+00 : f32
    %18 = vector.broadcast %cst_11 : f32 to vector<8x128xf32>
    %19 = arith.addf %18, %17 : vector<8x128xf32>
    %20 = arith.divf %18, %19 : vector<8x128xf32>
    %21 = vector.extract_strided_slice %14 {offsets = [0, 128], sizes = [8, 128], strides = [1, 1]} : vector<8x512xf32> to vector<8x128xf32>
    %22 = arith.negf %21 : vector<8x128xf32>
    %23 = math.exp %22 : vector<8x128xf32>
    %cst_12 = arith.constant 1.000000e+00 : f32
    %24 = vector.broadcast %cst_12 : f32 to vector<8x128xf32>
    %25 = arith.addf %24, %23 : vector<8x128xf32>
    %26 = arith.divf %24, %25 : vector<8x128xf32>
    %27 = vector.extract_strided_slice %14 {offsets = [0, 256], sizes = [8, 128], strides = [1, 1]} : vector<8x512xf32> to vector<8x128xf32>
    %28 = math.tanh %27 : vector<8x128xf32>
    %29 = vector.extract_strided_slice %14 {offsets = [0, 384], sizes = [8, 128], strides = [1, 1]} : vector<8x512xf32> to vector<8x128xf32>
    %30 = arith.negf %29 : vector<8x128xf32>
    %31 = math.exp %30 : vector<8x128xf32>
    %cst_13 = arith.constant 1.000000e+00 : f32
    %32 = vector.broadcast %cst_13 : f32 to vector<8x128xf32>
    %33 = arith.addf %32, %31 : vector<8x128xf32>
    %34 = arith.divf %32, %33 : vector<8x128xf32>
    %35 = arith.mulf %26, %9 : vector<8x128xf32>
    %36 = arith.mulf %20, %28 : vector<8x128xf32>
    %37 = arith.addf %35, %36 : vector<8x128xf32>
    %38 = math.tanh %37 : vector<8x128xf32>
    %39 = arith.mulf %34, %38 : vector<8x128xf32>
    %40 = vector.extract_strided_slice %7 {offsets = [8, 0], sizes = [8, 512], strides = [1, 1]} : vector<64x512xf32> to vector<8x512xf32>
    %41 = arith.truncf %39 : vector<8x128xf32> to vector<8x128xbf16>
    %c0_14 = arith.constant 0 : index
    %c0_15 = arith.constant 0 : index
    %42 = vector.load %arg3[%c0_14, %c0_15] : memref<128x512xbf16, #tpu.memory_space<vmem>>, vector<128x512xbf16>
    %cst_16 = arith.constant dense<0.000000e+00> : vector<8x512xf32>
    %43 = tpu.matmul %41, %42, %cst_16 {dimension_numbers = #tpu.dot_dimension_numbers<[1], [0], [0], [1], [0, 0, 1, 1], [], []>} : vector<8x128xbf16>, vector<128x512xbf16>, vector<8x512xf32> -> vector<8x512xf32>
    %44 = arith.addf %40, %43 : vector<8x512xf32>
    %45 = vector.extract_strided_slice %44 {offsets = [0, 0], sizes = [8, 128], strides = [1, 1]} : vector<8x512xf32> to vector<8x128xf32>
    %46 = arith.negf %45 : vector<8x128xf32>
    %47 = math.exp %46 : vector<8x128xf32>
    %cst_17 = arith.constant 1.000000e+00 : f32
    %48 = vector.broadcast %cst_17 : f32 to vector<8x128xf32>
    %49 = arith.addf %48, %47 : vector<8x128xf32>
    %50 = arith.divf %48, %49 : vector<8x128xf32>
    %51 = vector.extract_strided_slice %44 {offsets = [0, 128], sizes = [8, 128], strides = [1, 1]} : vector<8x512xf32> to vector<8x128xf32>
    %52 = arith.negf %51 : vector<8x128xf32>
    %53 = math.exp %52 : vector<8x128xf32>
    %cst_18 = arith.constant 1.000000e+00 : f32
    %54 = vector.broadcast %cst_18 : f32 to vector<8x128xf32>
    %55 = arith.addf %54, %53 : vector<8x128xf32>
    %56 = arith.divf %54, %55 : vector<8x128xf32>
    %57 = vector.extract_strided_slice %44 {offsets = [0, 256], sizes = [8, 128], strides = [1, 1]} : vector<8x512xf32> to vector<8x128xf32>
    %58 = math.tanh %57 : vector<8x128xf32>
    %59 = vector.extract_strided_slice %44 {offsets = [0, 384], sizes = [8, 128], strides = [1, 1]} : vector<8x512xf32> to vector<8x128xf32>
    %60 = arith.negf %59 : vector<8x128xf32>
    %61 = math.exp %60 : vector<8x128xf32>
    %cst_19 = arith.constant 1.000000e+00 : f32
    %62 = vector.broadcast %cst_19 : f32 to vector<8x128xf32>
    %63 = arith.addf %62, %61 : vector<8x128xf32>
    %64 = arith.divf %62, %63 : vector<8x128xf32>
    %65 = arith.mulf %56, %37 : vector<8x128xf32>
    %66 = arith.mulf %50, %58 : vector<8x128xf32>
    %67 = arith.addf %65, %66 : vector<8x128xf32>
    %68 = math.tanh %67 : vector<8x128xf32>
    %69 = arith.mulf %64, %68 : vector<8x128xf32>
    %70 = vector.extract_strided_slice %7 {offsets = [16, 0], sizes = [8, 512], strides = [1, 1]} : vector<64x512xf32> to vector<8x512xf32>
    %71 = arith.truncf %69 : vector<8x128xf32> to vector<8x128xbf16>
    %c0_20 = arith.constant 0 : index
    %c0_21 = arith.constant 0 : index
    %72 = vector.load %arg3[%c0_20, %c0_21] : memref<128x512xbf16, #tpu.memory_space<vmem>>, vector<128x512xbf16>
    %cst_22 = arith.constant dense<0.000000e+00> : vector<8x512xf32>
    %73 = tpu.matmul %71, %72, %cst_22 {dimension_numbers = #tpu.dot_dimension_numbers<[1], [0], [0], [1], [0, 0, 1, 1], [], []>} : vector<8x128xbf16>, vector<128x512xbf16>, vector<8x512xf32> -> vector<8x512xf32>
    %74 = arith.addf %70, %73 : vector<8x512xf32>
    %75 = vector.extract_strided_slice %74 {offsets = [0, 0], sizes = [8, 128], strides = [1, 1]} : vector<8x512xf32> to vector<8x128xf32>
    %76 = arith.negf %75 : vector<8x128xf32>
    %77 = math.exp %76 : vector<8x128xf32>
    %cst_23 = arith.constant 1.000000e+00 : f32
    %78 = vector.broadcast %cst_23 : f32 to vector<8x128xf32>
    %79 = arith.addf %78, %77 : vector<8x128xf32>
    %80 = arith.divf %78, %79 : vector<8x128xf32>
    %81 = vector.extract_strided_slice %74 {offsets = [0, 128], sizes = [8, 128], strides = [1, 1]} : vector<8x512xf32> to vector<8x128xf32>
    %82 = arith.negf %81 : vector<8x128xf32>
    %83 = math.exp %82 : vector<8x128xf32>
    %cst_24 = arith.constant 1.000000e+00 : f32
    %84 = vector.broadcast %cst_24 : f32 to vector<8x128xf32>
    %85 = arith.addf %84, %83 : vector<8x128xf32>
    %86 = arith.divf %84, %85 : vector<8x128xf32>
    %87 = vector.extract_strided_slice %74 {offsets = [0, 256], sizes = [8, 128], strides = [1, 1]} : vector<8x512xf32> to vector<8x128xf32>
    %88 = math.tanh %87 : vector<8x128xf32>
    %89 = vector.extract_strided_slice %74 {offsets = [0, 384], sizes = [8, 128], strides = [1, 1]} : vector<8x512xf32> to vector<8x128xf32>
    %90 = arith.negf %89 : vector<8x128xf32>
    %91 = math.exp %90 : vector<8x128xf32>
    %cst_25 = arith.constant 1.000000e+00 : f32
    %92 = vector.broadcast %cst_25 : f32 to vector<8x128xf32>
    %93 = arith.addf %92, %91 : vector<8x128xf32>
    %94 = arith.divf %92, %93 : vector<8x128xf32>
    %95 = arith.mulf %86, %67 : vector<8x128xf32>
    %96 = arith.mulf %80, %88 : vector<8x128xf32>
    %97 = arith.addf %95, %96 : vector<8x128xf32>
    %98 = math.tanh %97 : vector<8x128xf32>
    %99 = arith.mulf %94, %98 : vector<8x128xf32>
    %100 = vector.extract_strided_slice %7 {offsets = [24, 0], sizes = [8, 512], strides = [1, 1]} : vector<64x512xf32> to vector<8x512xf32>
    %101 = arith.truncf %99 : vector<8x128xf32> to vector<8x128xbf16>
    %c0_26 = arith.constant 0 : index
    %c0_27 = arith.constant 0 : index
    %102 = vector.load %arg3[%c0_26, %c0_27] : memref<128x512xbf16, #tpu.memory_space<vmem>>, vector<128x512xbf16>
    %cst_28 = arith.constant dense<0.000000e+00> : vector<8x512xf32>
    %103 = tpu.matmul %101, %102, %cst_28 {dimension_numbers = #tpu.dot_dimension_numbers<[1], [0], [0], [1], [0, 0, 1, 1], [], []>} : vector<8x128xbf16>, vector<128x512xbf16>, vector<8x512xf32> -> vector<8x512xf32>
    %104 = arith.addf %100, %103 : vector<8x512xf32>
    %105 = vector.extract_strided_slice %104 {offsets = [0, 0], sizes = [8, 128], strides = [1, 1]} : vector<8x512xf32> to vector<8x128xf32>
    %106 = arith.negf %105 : vector<8x128xf32>
    %107 = math.exp %106 : vector<8x128xf32>
    %cst_29 = arith.constant 1.000000e+00 : f32
    %108 = vector.broadcast %cst_29 : f32 to vector<8x128xf32>
    %109 = arith.addf %108, %107 : vector<8x128xf32>
    %110 = arith.divf %108, %109 : vector<8x128xf32>
    %111 = vector.extract_strided_slice %104 {offsets = [0, 128], sizes = [8, 128], strides = [1, 1]} : vector<8x512xf32> to vector<8x128xf32>
    %112 = arith.negf %111 : vector<8x128xf32>
    %113 = math.exp %112 : vector<8x128xf32>
    %cst_30 = arith.constant 1.000000e+00 : f32
    %114 = vector.broadcast %cst_30 : f32 to vector<8x128xf32>
    %115 = arith.addf %114, %113 : vector<8x128xf32>
    %116 = arith.divf %114, %115 : vector<8x128xf32>
    %117 = vector.extract_strided_slice %104 {offsets = [0, 256], sizes = [8, 128], strides = [1, 1]} : vector<8x512xf32> to vector<8x128xf32>
    %118 = math.tanh %117 : vector<8x128xf32>
    %119 = vector.extract_strided_slice %104 {offsets = [0, 384], sizes = [8, 128], strides = [1, 1]} : vector<8x512xf32> to vector<8x128xf32>
    %120 = arith.negf %119 : vector<8x128xf32>
    %121 = math.exp %120 : vector<8x128xf32>
    %cst_31 = arith.constant 1.000000e+00 : f32
    %122 = vector.broadcast %cst_31 : f32 to vector<8x128xf32>
    %123 = arith.addf %122, %121 : vector<8x128xf32>
    %124 = arith.divf %122, %123 : vector<8x128xf32>
    %125 = arith.mulf %116, %97 : vector<8x128xf32>
    %126 = arith.mulf %110, %118 : vector<8x128xf32>
    %127 = arith.addf %125, %126 : vector<8x128xf32>
    %128 = math.tanh %127 : vector<8x128xf32>
    %129 = arith.mulf %124, %128 : vector<8x128xf32>
    %130 = vector.extract_strided_slice %7 {offsets = [32, 0], sizes = [8, 512], strides = [1, 1]} : vector<64x512xf32> to vector<8x512xf32>
    %131 = arith.truncf %129 : vector<8x128xf32> to vector<8x128xbf16>
    %c0_32 = arith.constant 0 : index
    %c0_33 = arith.constant 0 : index
    %132 = vector.load %arg3[%c0_32, %c0_33] : memref<128x512xbf16, #tpu.memory_space<vmem>>, vector<128x512xbf16>
    %cst_34 = arith.constant dense<0.000000e+00> : vector<8x512xf32>
    %133 = tpu.matmul %131, %132, %cst_34 {dimension_numbers = #tpu.dot_dimension_numbers<[1], [0], [0], [1], [0, 0, 1, 1], [], []>} : vector<8x128xbf16>, vector<128x512xbf16>, vector<8x512xf32> -> vector<8x512xf32>
    %134 = arith.addf %130, %133 : vector<8x512xf32>
    %135 = vector.extract_strided_slice %134 {offsets = [0, 0], sizes = [8, 128], strides = [1, 1]} : vector<8x512xf32> to vector<8x128xf32>
    %136 = arith.negf %135 : vector<8x128xf32>
    %137 = math.exp %136 : vector<8x128xf32>
    %cst_35 = arith.constant 1.000000e+00 : f32
    %138 = vector.broadcast %cst_35 : f32 to vector<8x128xf32>
    %139 = arith.addf %138, %137 : vector<8x128xf32>
    %140 = arith.divf %138, %139 : vector<8x128xf32>
    %141 = vector.extract_strided_slice %134 {offsets = [0, 128], sizes = [8, 128], strides = [1, 1]} : vector<8x512xf32> to vector<8x128xf32>
    %142 = arith.negf %141 : vector<8x128xf32>
    %143 = math.exp %142 : vector<8x128xf32>
    %cst_36 = arith.constant 1.000000e+00 : f32
    %144 = vector.broadcast %cst_36 : f32 to vector<8x128xf32>
    %145 = arith.addf %144, %143 : vector<8x128xf32>
    %146 = arith.divf %144, %145 : vector<8x128xf32>
    %147 = vector.extract_strided_slice %134 {offsets = [0, 256], sizes = [8, 128], strides = [1, 1]} : vector<8x512xf32> to vector<8x128xf32>
    %148 = math.tanh %147 : vector<8x128xf32>
    %149 = vector.extract_strided_slice %134 {offsets = [0, 384], sizes = [8, 128], strides = [1, 1]} : vector<8x512xf32> to vector<8x128xf32>
    %150 = arith.negf %149 : vector<8x128xf32>
    %151 = math.exp %150 : vector<8x128xf32>
    %cst_37 = arith.constant 1.000000e+00 : f32
    %152 = vector.broadcast %cst_37 : f32 to vector<8x128xf32>
    %153 = arith.addf %152, %151 : vector<8x128xf32>
    %154 = arith.divf %152, %153 : vector<8x128xf32>
    %155 = arith.mulf %146, %127 : vector<8x128xf32>
    %156 = arith.mulf %140, %148 : vector<8x128xf32>
    %157 = arith.addf %155, %156 : vector<8x128xf32>
    %158 = math.tanh %157 : vector<8x128xf32>
    %159 = arith.mulf %154, %158 : vector<8x128xf32>
    %160 = vector.extract_strided_slice %7 {offsets = [40, 0], sizes = [8, 512], strides = [1, 1]} : vector<64x512xf32> to vector<8x512xf32>
    %161 = arith.truncf %159 : vector<8x128xf32> to vector<8x128xbf16>
    %c0_38 = arith.constant 0 : index
    %c0_39 = arith.constant 0 : index
    %162 = vector.load %arg3[%c0_38, %c0_39] : memref<128x512xbf16, #tpu.memory_space<vmem>>, vector<128x512xbf16>
    %cst_40 = arith.constant dense<0.000000e+00> : vector<8x512xf32>
    %163 = tpu.matmul %161, %162, %cst_40 {dimension_numbers = #tpu.dot_dimension_numbers<[1], [0], [0], [1], [0, 0, 1, 1], [], []>} : vector<8x128xbf16>, vector<128x512xbf16>, vector<8x512xf32> -> vector<8x512xf32>
    %164 = arith.addf %160, %163 : vector<8x512xf32>
    %165 = vector.extract_strided_slice %164 {offsets = [0, 0], sizes = [8, 128], strides = [1, 1]} : vector<8x512xf32> to vector<8x128xf32>
    %166 = arith.negf %165 : vector<8x128xf32>
    %167 = math.exp %166 : vector<8x128xf32>
    %cst_41 = arith.constant 1.000000e+00 : f32
    %168 = vector.broadcast %cst_41 : f32 to vector<8x128xf32>
    %169 = arith.addf %168, %167 : vector<8x128xf32>
    %170 = arith.divf %168, %169 : vector<8x128xf32>
    %171 = vector.extract_strided_slice %164 {offsets = [0, 128], sizes = [8, 128], strides = [1, 1]} : vector<8x512xf32> to vector<8x128xf32>
    %172 = arith.negf %171 : vector<8x128xf32>
    %173 = math.exp %172 : vector<8x128xf32>
    %cst_42 = arith.constant 1.000000e+00 : f32
    %174 = vector.broadcast %cst_42 : f32 to vector<8x128xf32>
    %175 = arith.addf %174, %173 : vector<8x128xf32>
    %176 = arith.divf %174, %175 : vector<8x128xf32>
    %177 = vector.extract_strided_slice %164 {offsets = [0, 256], sizes = [8, 128], strides = [1, 1]} : vector<8x512xf32> to vector<8x128xf32>
    %178 = math.tanh %177 : vector<8x128xf32>
    %179 = vector.extract_strided_slice %164 {offsets = [0, 384], sizes = [8, 128], strides = [1, 1]} : vector<8x512xf32> to vector<8x128xf32>
    %180 = arith.negf %179 : vector<8x128xf32>
    %181 = math.exp %180 : vector<8x128xf32>
    %cst_43 = arith.constant 1.000000e+00 : f32
    %182 = vector.broadcast %cst_43 : f32 to vector<8x128xf32>
    %183 = arith.addf %182, %181 : vector<8x128xf32>
    %184 = arith.divf %182, %183 : vector<8x128xf32>
    %185 = arith.mulf %176, %157 : vector<8x128xf32>
    %186 = arith.mulf %170, %178 : vector<8x128xf32>
    %187 = arith.addf %185, %186 : vector<8x128xf32>
    %188 = math.tanh %187 : vector<8x128xf32>
    %189 = arith.mulf %184, %188 : vector<8x128xf32>
    %190 = vector.extract_strided_slice %7 {offsets = [48, 0], sizes = [8, 512], strides = [1, 1]} : vector<64x512xf32> to vector<8x512xf32>
    %191 = arith.truncf %189 : vector<8x128xf32> to vector<8x128xbf16>
    %c0_44 = arith.constant 0 : index
    %c0_45 = arith.constant 0 : index
    %192 = vector.load %arg3[%c0_44, %c0_45] : memref<128x512xbf16, #tpu.memory_space<vmem>>, vector<128x512xbf16>
    %cst_46 = arith.constant dense<0.000000e+00> : vector<8x512xf32>
    %193 = tpu.matmul %191, %192, %cst_46 {dimension_numbers = #tpu.dot_dimension_numbers<[1], [0], [0], [1], [0, 0, 1, 1], [], []>} : vector<8x128xbf16>, vector<128x512xbf16>, vector<8x512xf32> -> vector<8x512xf32>
    %194 = arith.addf %190, %193 : vector<8x512xf32>
    %195 = vector.extract_strided_slice %194 {offsets = [0, 0], sizes = [8, 128], strides = [1, 1]} : vector<8x512xf32> to vector<8x128xf32>
    %196 = arith.negf %195 : vector<8x128xf32>
    %197 = math.exp %196 : vector<8x128xf32>
    %cst_47 = arith.constant 1.000000e+00 : f32
    %198 = vector.broadcast %cst_47 : f32 to vector<8x128xf32>
    %199 = arith.addf %198, %197 : vector<8x128xf32>
    %200 = arith.divf %198, %199 : vector<8x128xf32>
    %201 = vector.extract_strided_slice %194 {offsets = [0, 128], sizes = [8, 128], strides = [1, 1]} : vector<8x512xf32> to vector<8x128xf32>
    %202 = arith.negf %201 : vector<8x128xf32>
    %203 = math.exp %202 : vector<8x128xf32>
    %cst_48 = arith.constant 1.000000e+00 : f32
    %204 = vector.broadcast %cst_48 : f32 to vector<8x128xf32>
    %205 = arith.addf %204, %203 : vector<8x128xf32>
    %206 = arith.divf %204, %205 : vector<8x128xf32>
    %207 = vector.extract_strided_slice %194 {offsets = [0, 256], sizes = [8, 128], strides = [1, 1]} : vector<8x512xf32> to vector<8x128xf32>
    %208 = math.tanh %207 : vector<8x128xf32>
    %209 = vector.extract_strided_slice %194 {offsets = [0, 384], sizes = [8, 128], strides = [1, 1]} : vector<8x512xf32> to vector<8x128xf32>
    %210 = arith.negf %209 : vector<8x128xf32>
    %211 = math.exp %210 : vector<8x128xf32>
    %cst_49 = arith.constant 1.000000e+00 : f32
    %212 = vector.broadcast %cst_49 : f32 to vector<8x128xf32>
    %213 = arith.addf %212, %211 : vector<8x128xf32>
    %214 = arith.divf %212, %213 : vector<8x128xf32>
    %215 = arith.mulf %206, %187 : vector<8x128xf32>
    %216 = arith.mulf %200, %208 : vector<8x128xf32>
    %217 = arith.addf %215, %216 : vector<8x128xf32>
    %218 = math.tanh %217 : vector<8x128xf32>
    %219 = arith.mulf %214, %218 : vector<8x128xf32>
    %220 = vector.extract_strided_slice %7 {offsets = [56, 0], sizes = [8, 512], strides = [1, 1]} : vector<64x512xf32> to vector<8x512xf32>
    %221 = arith.truncf %219 : vector<8x128xf32> to vector<8x128xbf16>
    %c0_50 = arith.constant 0 : index
    %c0_51 = arith.constant 0 : index
    %222 = vector.load %arg3[%c0_50, %c0_51] : memref<128x512xbf16, #tpu.memory_space<vmem>>, vector<128x512xbf16>
    %cst_52 = arith.constant dense<0.000000e+00> : vector<8x512xf32>
    %223 = tpu.matmul %221, %222, %cst_52 {dimension_numbers = #tpu.dot_dimension_numbers<[1], [0], [0], [1], [0, 0, 1, 1], [], []>} : vector<8x128xbf16>, vector<128x512xbf16>, vector<8x512xf32> -> vector<8x512xf32>
    %224 = arith.addf %220, %223 : vector<8x512xf32>
    %225 = vector.extract_strided_slice %224 {offsets = [0, 0], sizes = [8, 128], strides = [1, 1]} : vector<8x512xf32> to vector<8x128xf32>
    %226 = arith.negf %225 : vector<8x128xf32>
    %227 = math.exp %226 : vector<8x128xf32>
    %cst_53 = arith.constant 1.000000e+00 : f32
    %228 = vector.broadcast %cst_53 : f32 to vector<8x128xf32>
    %229 = arith.addf %228, %227 : vector<8x128xf32>
    %230 = arith.divf %228, %229 : vector<8x128xf32>
    %231 = vector.extract_strided_slice %224 {offsets = [0, 128], sizes = [8, 128], strides = [1, 1]} : vector<8x512xf32> to vector<8x128xf32>
    %232 = arith.negf %231 : vector<8x128xf32>
    %233 = math.exp %232 : vector<8x128xf32>
    %cst_54 = arith.constant 1.000000e+00 : f32
    %234 = vector.broadcast %cst_54 : f32 to vector<8x128xf32>
    %235 = arith.addf %234, %233 : vector<8x128xf32>
    %236 = arith.divf %234, %235 : vector<8x128xf32>
    %237 = vector.extract_strided_slice %224 {offsets = [0, 256], sizes = [8, 128], strides = [1, 1]} : vector<8x512xf32> to vector<8x128xf32>
    %238 = math.tanh %237 : vector<8x128xf32>
    %239 = vector.extract_strided_slice %224 {offsets = [0, 384], sizes = [8, 128], strides = [1, 1]} : vector<8x512xf32> to vector<8x128xf32>
    %240 = arith.negf %239 : vector<8x128xf32>
    %241 = math.exp %240 : vector<8x128xf32>
    %cst_55 = arith.constant 1.000000e+00 : f32
    %242 = vector.broadcast %cst_55 : f32 to vector<8x128xf32>
    %243 = arith.addf %242, %241 : vector<8x128xf32>
    %244 = arith.divf %242, %243 : vector<8x128xf32>
    %245 = arith.mulf %236, %217 : vector<8x128xf32>
    %246 = arith.mulf %230, %238 : vector<8x128xf32>
    %247 = arith.addf %245, %246 : vector<8x128xf32>
    %248 = math.tanh %247 : vector<8x128xf32>
    %249 = arith.mulf %244, %248 : vector<8x128xf32>
    %250 = arith.truncf %249 : vector<8x128xf32> to vector<8x128xbf16>
    %c0_56 = arith.constant 0 : index
    %c0_57 = arith.constant 0 : index
    %251 = vector.load %arg5[%c0_56, %c0_57] : memref<128x256xbf16, #tpu.memory_space<vmem>>, vector<128x256xbf16>
    %cst_58 = arith.constant dense<0.000000e+00> : vector<8x256xf32>
    %252 = tpu.matmul %250, %251, %cst_58 {dimension_numbers = #tpu.dot_dimension_numbers<[1], [0], [0], [1], [0, 0, 1, 1], [], []>} : vector<8x128xbf16>, vector<128x256xbf16>, vector<8x256xf32> -> vector<8x256xf32>
    %c0_59 = arith.constant 0 : index
    %c0_60 = arith.constant 0 : index
    %253 = vector.load %arg6[%c0_59, %c0_60] : memref<1x256xf32, #tpu.memory_space<vmem>>, vector<1x256xf32>
    %254 = vector.broadcast %253 : vector<1x256xf32> to vector<8x256xf32>
    %255 = arith.addf %252, %254 : vector<8x256xf32>
    %cst_61 = arith.constant 0.000000e+00 : f32
    %256 = vector.broadcast %cst_61 : f32 to vector<8x256xf32>
    %257 = arith.maximumf %255, %256 : vector<8x256xf32>
    %258 = arith.truncf %257 : vector<8x256xf32> to vector<8x256xbf16>
    %c0_62 = arith.constant 0 : index
    %c0_63 = arith.constant 0 : index
    %259 = vector.load %arg7[%c0_62, %c0_63] : memref<256x9xbf16, #tpu.memory_space<vmem>>, vector<256x9xbf16>
    %cst_64 = arith.constant dense<0.000000e+00> : vector<8x9xf32>
    %260 = tpu.matmul %258, %259, %cst_64 {dimension_numbers = #tpu.dot_dimension_numbers<[1], [0], [0], [1], [0, 0, 1, 1], [], []>} : vector<8x256xbf16>, vector<256x9xbf16>, vector<8x9xf32> -> vector<8x9xf32>
    %c0_65 = arith.constant 0 : index
    %c0_66 = arith.constant 0 : index
    %261 = vector.load %arg8[%c0_65, %c0_66] : memref<1x9xf32, #tpu.memory_space<vmem>>, vector<1x9xf32>
    %262 = vector.broadcast %261 : vector<1x9xf32> to vector<8x9xf32>
    %263 = arith.addf %260, %262 : vector<8x9xf32>
    %264 = vector.extract_strided_slice %263 {offsets = [0, 0], sizes = [8, 1], strides = [1, 1]} : vector<8x9xf32> to vector<8x1xf32>
    %265 = vector.extract_strided_slice %263 {offsets = [0, 1], sizes = [8, 8], strides = [1, 1]} : vector<8x9xf32> to vector<8x8xf32>
    %cst_67 = arith.constant dense<0.000000e+00> : vector<8xf32>
    %266 = vector.multi_reduction <add>, %265, %cst_67 [1] : vector<8x8xf32> to vector<8xf32>
    %267 = vector.shape_cast %266 : vector<8xf32> to vector<8x1xf32>
    %cst_68 = arith.constant 8.000000e+00 : f32
    %268 = vector.broadcast %cst_68 : f32 to vector<8x1xf32>
    %269 = arith.divf %267, %268 : vector<8x1xf32>
    %270 = vector.broadcast %269 : vector<8x1xf32> to vector<8x8xf32>
    %271 = arith.subf %265, %270 : vector<8x8xf32>
    %272 = vector.broadcast %264 : vector<8x1xf32> to vector<8x8xf32>
    %273 = arith.addf %272, %271 : vector<8x8xf32>
    %c0_69 = arith.constant 0 : index
    %c0_70 = arith.constant 0 : index
    %274 = vector.load %arg9[%c0_69, %c0_70] : memref<8x8xf32, #tpu.memory_space<vmem>>, vector<8x8xf32>
    tpu.vector_store %arg9[%c0_69, %c0_70], %273 {strides = array<i32>} : memref<8x8xf32, #tpu.memory_space<vmem>>, vector<8x8xf32>,
    return
  }
  func.func @transform_0(%arg0: i32) -> (i32, i32, i32) {
    %c0_i32 = arith.constant 0 : i32
    %c0_i32_0 = arith.constant 0 : i32
    %c0_i32_1 = arith.constant 0 : i32
    return %arg0, %c0_i32, %c0_i32_0 : i32, i32, i32
  }
  func.func @transform_1(%arg0: i32) -> (i32, i32) {
    %c0_i32 = arith.constant 0 : i32
    %c0_i32_0 = arith.constant 0 : i32
    %c0_i32_1 = arith.constant 0 : i32
    return %c0_i32, %c0_i32_0 : i32, i32
  }
  func.func @transform_2(%arg0: i32) -> (i32, i32) {
    %c0_i32 = arith.constant 0 : i32
    %c0_i32_0 = arith.constant 0 : i32
    %c0_i32_1 = arith.constant 0 : i32
    return %c0_i32, %c0_i32_0 : i32, i32
  }
  func.func @transform_3(%arg0: i32) -> (i32, i32) {
    %c0_i32 = arith.constant 0 : i32
    %c0_i32_0 = arith.constant 0 : i32
    %c0_i32_1 = arith.constant 0 : i32
    return %c0_i32, %c0_i32_0 : i32, i32
  }
  func.func @transform_4(%arg0: i32) -> (i32, i32) {
    %c0_i32 = arith.constant 0 : i32
    %c0_i32_0 = arith.constant 0 : i32
    %c0_i32_1 = arith.constant 0 : i32
    return %c0_i32, %c0_i32_0 : i32, i32
  }
  func.func @transform_5(%arg0: i32) -> (i32, i32) {
    %c0_i32 = arith.constant 0 : i32
    %c0_i32_0 = arith.constant 0 : i32
    %c0_i32_1 = arith.constant 0 : i32
    return %c0_i32, %c0_i32_0 : i32, i32
  }
  func.func @transform_6(%arg0: i32) -> (i32, i32) {
    %c0_i32 = arith.constant 0 : i32
    %c0_i32_0 = arith.constant 0 : i32
    %c0_i32_1 = arith.constant 0 : i32
    return %c0_i32, %c0_i32_0 : i32, i32
  }
  func.func @transform_7(%arg0: i32) -> (i32, i32) {
    %c0_i32 = arith.constant 0 : i32
    %c0_i32_0 = arith.constant 0 : i32
    %c0_i32_1 = arith.constant 0 : i32
    return %c0_i32, %c0_i32_0 : i32, i32
  }
  func.func @transform_8(%arg0: i32) -> (i32, i32) {
    %c0_i32 = arith.constant 0 : i32
    %c0_i32_0 = arith.constant 0 : i32
    return %arg0, %c0_i32 : i32, i32
  }
}

</mosaic_0001>

<bundles_post_ra>
// kernel: tpu_custom_call.1
= control target key start
LH: loop header
LB: loop body
LE: loop exit
PB: predicated region body
PF: predicated region fallthrough
CT: control target
= control target key end

     0   :  { %13 = vsyncpa [#allocation3], 0  ;;  %s2534_s27 = smov 0   ;;  %s3427_s0 = inlined_call_operand.vmem [shape: f32[2,64,16], index: 0, kind: input, shape index: {}]   ;;  %s3428_s1 = inlined_call_operand.vmem [shape: bf16[16,512], index: 1, kind: input, shape index: {}]   ;;  %s3429_s2 = inlined_call_operand.vmem [shape: bf16[128,512], index: 2, kind: input, shape index: {}]   ;;  %s3430_s3 = inlined_call_operand.vmem [shape: f32[1,512], index: 3, kind: input, shape index: {}]   ;;  %s3431_s4 = inlined_call_operand.hbm [shape: bf16[128,256], index: 4, kind: input, shape index: {}]   ;;  %s3432_s5 = inlined_call_operand.vmem [shape: f32[1,256], index: 5, kind: input, shape index: {}]   ;;  %s3433_s6 = inlined_call_operand.vmem [shape: bf16[256,9], index: 6, kind: input, shape index: {}]   ;;  %s3434_s7 = inlined_call_operand.vmem [shape: f32[1,9], index: 7, kind: input, shape index: {}]   ;;  %s3435_s8 = inlined_call_operand.vmem [shape: f32[16,8], index: 8, kind: output, shape index: {}]  }
   0x1 LB: > { %s2540_s28 = sadd.s32 4294967295, %s2482_s27   ;;  %p2033_p0 = scmp.ge.s32.totalorder %s2482_s27, 1  ;;  %s2482_s27 = sphi %s2534_s27, %s19_s27  }
   0x2   : > { %p223_p1 = scmp.lt.s32.totalorder %s2482_s27, 3  ;;  %s2484_s29 = smov [#allocation2]  }
   0x3   : > { %s244_s30 = sshll.u32 %s2484_s29, 4  ;;  %p2175_p3 = scmp.eq.s32.totalorder %s2540_s28, 0  ;;  %s245_s30 = int_to_ptr.vmem [resolvable:$true] %s244_s30 }
   0x4   : > { %p2544_p2 = pnand %p2033_p0, %p223_p1  ;;  %s2457_s10 = scalar_lea.vmem %s245_s30, 2048 }
   0x5   : > { %p2458_p7 = scmp.ne.s32.totalorder %s245_s30, %s2457_s10  ;;  %p2465_p10 = scmp.lt.s32.totalorder %s245_s30, %s245_s30 }
   0x6   : > { %p2171_p4 = pneg %p2544_p2  ;;  %p2466_p11 = scmp.lt.s32.totalorder %s2457_s10, %s2457_s10 }
   0x8   : > { %p2172_p5 = pnand %p2175_p3, %p2171_p4  ;;  %p2467_p12 = por %p2466_p11, %p2465_p10 }
   0xa   : > { %p2448_p6 = pneg %p2172_p5 }
   0xc   : > { %p2460_p8 = pnand %p2458_p7, %p2448_p6 }
   0xe   : > { %p2461_p9 = pneg %p2460_p8 }
  0x10   : > { %p2468_p13 = pnand %p2467_p12, %p2461_p9 }
  0x12   : > { %2471 = shalt.err (!%p2468_p13)
}
  0x13   : > { %s2485_s11 = smov 128   ;;  %s2486_s12 = smov 8  }
  0x14   : > { %2174 = dma.hbm_to_vmem [thread:$0]  (!%p2172_p5), %s3431_s4, 2048, %s245_s30, [#allocation3], %s2485_s11, %s2485_s11, %s2486_s12  }
  0x15   : > { %277 = sbr.rel (%p2544_p2) target bundleno = 2852 (0xb24), region = 52 }
  0x1a   : > { %2477 = dma.done.wait (%p2175_p3), [#allocation3], 2048  }
  0x1b   : > { %2479 = vsyncadd (%p2175_p3), [#allocation3], 4294965248  ;;  %p310_p0 = scmp.lt.s32.totalorder %s2540_s28, 1  ;;  %v3438_v0 = vmov 0   ;;  %v2192_v1 = vld [vmem:[%s3428_s1 + $0x4] ss:$16 sps:$4 sm:$0xff]   ;;  %v338_v49 = vlaneseq }
  0x1c   : > { %423 = vmatprep.mubr.bf16.mxu0 %v3438_v0  ;;  %496 = vmatprep.mubr.bf16.mxu1 %v3438_v0  ;;  %v2194_v2 = vld [vmem:[%s3428_s1 + $0xc] ss:$16 sps:$4 sm:$0xff]   ;;  %v2196_v3 = vld [vmem:[%s3428_s1] ss:$16 sps:$4 sm:$0xff]   ;;  %v2197_v4 = vld [vmem:[%s3428_s1 + $0x8] ss:$16 sps:$4 sm:$0xff]  }
  0x1d   : > { %s3487_s28 = smov (!%p310_p0, %s2540_s28), 1  ;;  %2190 = vset.pattern.permute.xlu1 %v3438_v0  ;;  %2191 = vset.pattern.permute.xlu0 %v3438_v0  ;;  %vm378_vm0 = vcmask 130048   ;;  %v2593_v8 = vld [vmem:[%s3429_s2 + $0xe4] ss:$16 sps:$4 sm:$0xff]   ;;  %v2598_v9 = vld [vmem:[%s3429_s2 + $0xec] ss:$16 sps:$4 sm:$0xff]  }
  0x1e   : > { %s2144_s15 = sshll.u32 %s3487_s28, 6  ;;  %405 = vmatprep.subr.bf16.mxu0 %v2192_v1  ;;  %478 = vmatprep.subr.bf16.mxu1 %v2194_v2  ;;  %v2603_v10 = vld [vmem:[%s3429_s2 + $0xe0] ss:$16 sps:$4 sm:$0xff]   ;;  %v2608_v11 = vld [vmem:[%s3429_s2 + $0xe8] ss:$16 sps:$4 sm:$0xff]   ;;  %v2842_v50 = vshrl.u32 %v338_v49, 7 }
  0x1f   : > { %s2574_s18 = scalar_lea.vmem %s3427_s0, %s2144_s15  ;;  %406 = vmatpush1.bf16.msra.mxu0 %v2196_v3  ;;  %479 = vmatpush1.bf16.msra.mxu1 %v2197_v4  ;;  %v2614_v12 = vld [vmem:[%s3429_s2 + $0xc4] ss:$16 sps:$4 sm:$0xff]   ;;  %v2621_v13 = vld [vmem:[%s3429_s2 + $0xcc] ss:$16 sps:$4 sm:$0xff]   ;;  %v2628_v14 = vld [vmem:[%s3429_s2 + $0xc0] ss:$16 sps:$4 sm:$0xff]  }
  0x20   : > { %v320_v5 = vld [vmem:[%s2574_s18] sm:$0xff]  ;;  %v321_v6 = vld [vmem:[%s2574_s18 + $0x8] sm:$0xff]  ;;  %729 = vmatprep.subr.bf16.mxu0 %v2593_v8  ;;  %770 = vmatprep.subr.bf16.mxu1 %v2598_v9  ;;  %v322_v16 = vld [vmem:[%s2574_s18 + $0x10] sm:$0xff]  ;;  %3443 = vst [vmem:[#allocation5_spill] sm:$0xff] %v2842_v50  ;;  %v348_v51 = vsub.s32 2, %v2842_v50  ;;  %v3437_v52 = vsub.s32 0, %v2842_v50 }
  0x21   : > { %v328_v7 = vpack.c.bf16 %v321_v6, %v320_v5  ;;  %v2633_v15 = vld [vmem:[%s3429_s2 + $0xc8] ss:$16 sps:$4 sm:$0xff]   ;;  %v2644_v18 = vld [vmem:[%s3429_s2 + $0xa4] ss:$16 sps:$4 sm:$0xff]   ;;  %v2650_v20 = vld [vmem:[%s3429_s2 + $0xac] ss:$16 sps:$4 sm:$0xff]  }
  0x22   : > { %v323_v17 = vld [vmem:[%s2574_s18 + $0x18] sm:$0xff]  ;;  %v2655_v21 = vld [vmem:[%s3429_s2 + $0xa0] ss:$16 sps:$4 sm:$0xff]   ;;  %v2668_v23 = vld [vmem:[%s3429_s2 + $0x84] ss:$16 sps:$4 sm:$0xff]   ;;  %v352_v53 = vsub.s32 3, %v2842_v50 }
  0x23   : > { %2045 = vmatmul.mubr.msk.bf16.vlgmr.msra.gmra.mxu0 %vm378_vm0, %v328_v7  ;;  %2049 = vmatmul.mubr.msk.bf16.vlgmr.msra.gmra.mxu1 %vm378_vm0, %v328_v7  ;;  %v329_v19 = vpack.c.bf16 %v323_v17, %v322_v16  ;;  %v2661_v22 = vld [vmem:[%s3429_s2 + $0xa8] ss:$16 sps:$4 sm:$0xff]   ;;  %v2674_v24 = vld [vmem:[%s3429_s2 + $0x8c] ss:$16 sps:$4 sm:$0xff]   ;;  %v2679_v25 = vld [vmem:[%s3429_s2 + $0x80] ss:$16 sps:$4 sm:$0xff]  }
  0x24   : > { %730 = vmatpush1.bf16.msra.mxu0 %v2603_v10  ;;  %771 = vmatpush1.bf16.msra.mxu1 %v2608_v11  ;;  %v324_v26 = vld [vmem:[%s2574_s18 + $0x20] sm:$0xff]  ;;  %v325_v27 = vld [vmem:[%s2574_s18 + $0x28] sm:$0xff]  ;;  %v326_v38 = vld [vmem:[%s2574_s18 + $0x30] sm:$0xff]  ;;  %v3436_v58 = vsub.s32 1, %v2842_v50  ;;  %s2488_s15 = smov 127   ;;  %vm1949_vm1 = vcmask 64512  }
  0x25   : > { %731 = vmatprep.subr.bf16.mxu0 %v2614_v12  ;;  %772 = vmatprep.subr.bf16.mxu1 %v2621_v13  ;;  %v2692_v28 = vld [vmem:[%s3429_s2 + $0x88] ss:$16 sps:$4 sm:$0xff]   ;;  %v2697_v29 = vld [vmem:[%s3429_s2 + $0x64] ss:$16 sps:$4 sm:$0xff]   ;;  %v2704_v30 = vld [vmem:[%s3429_s2 + $0x6c] ss:$16 sps:$4 sm:$0xff]   ;;  %v330_v31 = vpack.c.bf16 %v325_v27, %v324_v26 }
  0x26   : > { %433 = vmatprep.mubr.bf16.mxu0 %v3438_v0  ;;  %506 = vmatprep.mubr.bf16.mxu1 %v3438_v0  ;;  %v2710_v32 = vld [vmem:[%s3429_s2 + $0x60] ss:$16 sps:$4 sm:$0xff]   ;;  %v2715_v33 = vld [vmem:[%s3429_s2 + $0x68] ss:$16 sps:$4 sm:$0xff]   ;;  %v2722_v34 = vld [vmem:[%s3429_s2 + $0x44] ss:$16 sps:$4 sm:$0xff]  }
  0x27   : > { %v2728_v35 = vld [vmem:[%s3429_s2 + $0x4c] ss:$16 sps:$4 sm:$0xff]   ;;  %v2735_v36 = vld [vmem:[%s3429_s2 + $0x40] ss:$16 sps:$4 sm:$0xff]   ;;  %v2740_v37 = vld [vmem:[%s3429_s2 + $0x48] ss:$16 sps:$4 sm:$0xff]  }
  0x28   : > { %732 = vmatpush1.bf16.msra.mxu0 %v2628_v14  ;;  %773 = vmatpush1.bf16.msra.mxu1 %v2633_v15  ;;  %v327_v39 = vld [vmem:[%s2574_s18 + $0x38] sm:$0xff]  ;;  %v2751_v40 = vld [vmem:[%s3429_s2 + $0x24] ss:$16 sps:$4 sm:$0xff]   ;;  %v2763_v42 = vld [vmem:[%s3429_s2 + $0x20] ss:$16 sps:$4 sm:$0xff]   ;;  %s2040_s16 = sshll.u32 %s3487_s28, 3 }
  0x29   : > { %733 = vmatprep.subr.bf16.mxu0 %v2644_v18  ;;  %774 = vmatprep.subr.bf16.mxu1 %v2650_v20  ;;  %v2758_v41 = vld [vmem:[%s3429_s2 + $0x2c] ss:$16 sps:$4 sm:$0xff]   ;;  %v331_v43 = vpack.c.bf16 %v327_v39, %v326_v38  ;;  %v2768_v44 = vld [vmem:[%s3429_s2 + $0x28] ss:$16 sps:$4 sm:$0xff]   ;;  %v2773_v45 = vld [vmem:[%s3429_s2 + $0x4] ss:$16 sps:$4 sm:$0xff]   ;;  %s318_s20 = scalar_lea.vmem %s3435_s8, %s2040_s16 }
  0x2a   : > { %v2779_v46 = vld [vmem:[%s3429_s2 + $0xc] ss:$16 sps:$4 sm:$0xff]   ;;  %v2787_v47 = vld [vmem:[%s3429_s2] ss:$16 sps:$4 sm:$0xff]   ;;  %v2794_v48 = vld [vmem:[%s3429_s2 + $0x8] ss:$16 sps:$4 sm:$0xff]  }
  0x2b   : > { %2046 = vmatmul.mubr.msk.bf16.gmra.mxu0 %vm378_vm0, %v329_v19  ;;  %2050 = vmatmul.mubr.msk.bf16.gmra.mxu1 %vm378_vm0, %v329_v19  ;;  %v336_v54 = vld [vmem:[%s3430_s3] sm:$0xf] }
  0x2c   : > { %734 = vmatpush1.bf16.msra.mxu0 %v2655_v21  ;;  %443 = vmatprep.mubr.bf16.mxu0 %v3438_v0  ;;  %v2854_v57 = vrot.slane %v336_v54, %v348_v51  ;;  %v341_v61 = vrot.slane %v336_v54, %v3437_v52  ;;  %v2863_v62 = vrot.slane %v336_v54, %v352_v53 }
  0x2d   : > { %775 = vmatpush1.bf16.msra.mxu1 %v2661_v22  ;;  %735 = vmatprep.subr.bf16.mxu0 %v2668_v23  ;;  %v345_v2 = vrot.slane %v336_v54, %v3436_v58 }
  0x2e   : > { %776 = vmatprep.subr.bf16.mxu1 %v2674_v24  ;;  %516 = vmatprep.mubr.bf16.mxu1 %v3438_v0 }
  0x30   : > { %736 = vmatpush1.bf16.msra.mxu0 %v2679_v25 }
  0x31   : > { %777 = vmatpush1.bf16.msra.mxu1 %v2692_v28  ;;  %737 = vmatprep.subr.bf16.mxu0 %v2697_v29 }
  0x32   : > { %778 = vmatprep.subr.bf16.mxu1 %v2704_v30 }
  0x33   : > { %2047 = vmatmul.mubr.msk.bf16.gmra.mxu0 %vm378_vm0, %v330_v31  ;;  %2051 = vmatmul.mubr.msk.bf16.gmra.mxu1 %vm378_vm0, %v330_v31 }
  0x34   : > { %738 = vmatpush1.bf16.msra.mxu0 %v2710_v32  ;;  %453 = vmatprep.mubr.bf16.mxu0 %v3438_v0 }
  0x35   : > { %779 = vmatpush1.bf16.msra.mxu1 %v2715_v33  ;;  %739 = vmatprep.subr.bf16.mxu0 %v2722_v34 }
  0x36   : > { %780 = vmatprep.subr.bf16.mxu1 %v2728_v35  ;;  %526 = vmatprep.mubr.bf16.mxu1 %v3438_v0 }
  0x38   : > { %740 = vmatpush1.bf16.msra.mxu0 %v2735_v36 }
  0x39   : > { %781 = vmatpush1.bf16.msra.mxu1 %v2740_v37  ;;  %741 = vmatprep.subr.bf16.mxu0 %v2751_v40 }
  0x3a   : > { %782 = vmatprep.subr.bf16.mxu1 %v2758_v41 }
  0x3b   : > { %2048 = vmatmul.mubr.msk.bf16.gmra.mxu0 %vm378_vm0, %v331_v43  ;;  %2052 = vmatmul.mubr.msk.bf16.gmra.mxu1 %vm378_vm0, %v331_v43 }
  0x3c   : > { %742 = vmatpush1.bf16.msra.mxu0 %v2763_v42  ;;  %761 = vmatprep.mubr.bf16.mxu0 %v3438_v0 }
  0x3d   : > { %783 = vmatpush1.bf16.msra.mxu1 %v2768_v44  ;;  %743 = vmatprep.subr.bf16.mxu0 %v2773_v45 }
  0x3e   : > { %784 = vmatprep.subr.bf16.mxu1 %v2779_v46  ;;  %802 = vmatprep.mubr.bf16.mxu1 %v3438_v0 }
  0x40   : > { %744 = vmatpush1.bf16.msra.mxu0 %v2787_v47 }
  0x41   : > { %785 = vmatpush1.bf16.msra.mxu1 %v2794_v48  ;;  %840 = vmatprep.subr.bf16.mxu0 %v2593_v8 }
  0x42   : > { %881 = vmatprep.subr.bf16.mxu1 %v2598_v9 }
  0x43   : > { %762 = vmatmul.mubr.bf16.vlgmr.msra.gmra.mxu0 %v3438_v0 }
  0x44   : > { %803 = vmatmul.mubr.bf16.vlgmr.msra.gmra.mxu1 %v3438_v0  ;;  %841 = vmatpush1.bf16.msra.mxu0 %v2603_v10 }
  0x45   : > { %882 = vmatpush1.bf16.msra.mxu1 %v2608_v11  ;;  %842 = vmatprep.subr.bf16.mxu0 %v2614_v12 }
  0x46   : > { %883 = vmatprep.subr.bf16.mxu1 %v2621_v13  ;;  %872 = vmatprep.mubr.bf16.mxu0 %v3438_v0 }
  0x47   : > { %913 = vmatprep.mubr.bf16.mxu1 %v3438_v0 }
  0x48   : > { %843 = vmatpush1.bf16.msra.mxu0 %v2628_v14 }
  0x49   : > { %884 = vmatpush1.bf16.msra.mxu1 %v2633_v15  ;;  %844 = vmatprep.subr.bf16.mxu0 %v2644_v18 }
  0x4a   : > { %885 = vmatprep.subr.bf16.mxu1 %v2650_v20 }
  0x4c   : > { %845 = vmatpush1.bf16.msra.mxu0 %v2655_v21 }
  0x4d   : > { %886 = vmatpush1.bf16.msra.mxu1 %v2661_v22  ;;  %846 = vmatprep.subr.bf16.mxu0 %v2668_v23 }
  0x4e   : > { %887 = vmatprep.subr.bf16.mxu1 %v2674_v24 }
  0x50   : > { %847 = vmatpush1.bf16.msra.mxu0 %v2679_v25 }
  0x51   : > { %888 = vmatpush1.bf16.msra.mxu1 %v2692_v28  ;;  %848 = vmatprep.subr.bf16.mxu0 %v2697_v29 }
  0x52   : > { %889 = vmatprep.subr.bf16.mxu1 %v2704_v30 }
  0x54   : > { %849 = vmatpush1.bf16.msra.mxu0 %v2710_v32 }
  0x55   : > { %890 = vmatpush1.bf16.msra.mxu1 %v2715_v33  ;;  %850 = vmatprep.subr.bf16.mxu0 %v2722_v34 }
  0x56   : > { %891 = vmatprep.subr.bf16.mxu1 %v2728_v35 }
  0x58   : > { %851 = vmatpush1.bf16.msra.mxu0 %v2735_v36 }
  0x59   : > { %892 = vmatpush1.bf16.msra.mxu1 %v2740_v37  ;;  %852 = vmatprep.subr.bf16.mxu0 %v2751_v40 }
  0x5a   : > { %893 = vmatprep.subr.bf16.mxu1 %v2758_v41 }
  0x5c   : > { %853 = vmatpush1.bf16.msra.mxu0 %v2763_v42 }
  0x5d   : > { %894 = vmatpush1.bf16.msra.mxu1 %v2768_v44  ;;  %854 = vmatprep.subr.bf16.mxu0 %v2773_v45 }
  0x5e   : > { %895 = vmatprep.subr.bf16.mxu1 %v2779_v46 }
  0x60   : > { %855 = vmatpush1.bf16.msra.mxu0 %v2787_v47 }
  0x61   : > { %896 = vmatpush1.bf16.msra.mxu1 %v2794_v48  ;;  %951 = vmatprep.subr.bf16.mxu0 %v2593_v8 }
  0x62   : > { %992 = vmatprep.subr.bf16.mxu1 %v2598_v9 }
  0xe3   : > { %v2850_v55 = vpop.f32.mrf.mxu0  ;;  %v2852_v56 = vpop.f32.mrf.mxu1 }
  0xe5   : > { %v2857_v59 = vpop.f32.mrf.mxu0  ;;  %v2859_v60 = vpop.f32.mrf.mxu1 }
  0xe7   : > { %v429_v63 = vpop.f32.mrf.mxu0  ;;  %v502_v1 = vpop.f32.mrf.mxu1 }
  0xe8   : > { %v2867_v3 = vadd.f32 %v429_v63, %v341_v61  ;;  %v2870_v4 = vadd.f32 %v502_v1, %v2854_v57 }
  0xe9   : > { %v431_v5 = vpop.f32.mrf.mxu0  ;;  %v504_v6 = vpop.f32.mrf.mxu1 }
  0xea   : > { %v2872_v7 = vadd.f32 %v431_v5, %v345_v2  ;;  %v2875_v16 = vadd.f32 %v504_v6, %v2863_v62 }
  0xeb   : > { %v435_v17 = vpop.f32.mrf.mxu0  ;;  %v508_v19 = vpop.f32.mrf.mxu1 }
  0xec   : > { %v2877_v26 = vadd.f32 %v435_v17, %v341_v61  ;;  %v2880_v27 = vadd.f32 %v508_v19, %v2854_v57 }
  0xed   : > { %v437_v31 = vpop.f32.mrf.mxu0  ;;  %v510_v38 = vpop.f32.mrf.mxu1 }
  0xee   : > { %3444 = vst [vmem:[#allocation6_spill] sm:$0xff] %v2880_v27  ;;  %v2882_v39 = vadd.f32 %v437_v31, %v345_v2  ;;  %v2885_v43 = vadd.f32 %v510_v38, %v2863_v62 }
  0xef   : > { %v439_v49 = vpop.f32.mrf.mxu0  ;;  %v512_v51 = vpop.f32.mrf.mxu1 }
  0xf0   : > { %v2887_v53 = vadd.f32 %v439_v49, %v341_v61  ;;  %v2890_v54 = vadd.f32 %v512_v51, %v2854_v57 }
  0xf1   : > { %v441_v63 = vpop.f32.mrf.mxu0  ;;  %v514_v1 = vpop.f32.mrf.mxu1 }
  0xf2   : > { %3445 = vst [vmem:[#allocation7_spill] sm:$0xff] %v2887_v53  ;;  %3446 = vst [vmem:[#allocation8_spill] sm:$0xff] %v2890_v54  ;;  %v2892_v5 = vadd.f32 %v441_v63, %v345_v2  ;;  %v2895_v6 = vadd.f32 %v514_v1, %v2863_v62 }
  0xf3   : > { %v445_v17 = vpop.f32.mrf.mxu0  ;;  %v518_v19 = vpop.f32.mrf.mxu1 }
  0xf4   : > { %3447 = vst [vmem:[#allocation9_spill] sm:$0xff] %v2892_v5  ;;  %3448 = vst [vmem:[#allocation10_spill] sm:$0xff] %v2895_v6  ;;  %v2897_v31 = vadd.f32 %v445_v17, %v341_v61  ;;  %v2900_v38 = vadd.f32 %v518_v19, %v2854_v57 }
  0xf5   : > { %v447_v58 = vpop.f32.mrf.mxu0  ;;  %v520_v49 = vpop.f32.mrf.mxu1 }
  0xf6   : > { %3449 = vst [vmem:[#allocation11_spill] sm:$0xff] %v2897_v31  ;;  %3450 = vst [vmem:[#allocation12_spill] sm:$0xff] %v2900_v38  ;;  %v2902_v52 = vadd.f32 %v447_v58, %v345_v2  ;;  %v2905_v51 = vadd.f32 %v520_v49, %v2863_v62 }
  0xf7   : > { %v449_v0 = vpop.f32.mrf.mxu0  ;;  %v522_v63 = vpop.f32.mrf.mxu1 }
  0xf8   : > { %3451 = vst [vmem:[#allocation13_spill] sm:$0xff] %v2902_v52  ;;  %3452 = vst [vmem:[#allocation14_spill] sm:$0xff] %v2905_v51  ;;  %v2907_v50 = vadd.f32 %v449_v0, %v341_v61  ;;  %v2910_v1 = vadd.f32 %v522_v63, %v2854_v57 }
  0xf9   : > { %v451_v54 = vpop.f32.mrf.mxu0  ;;  %v524_v17 = vpop.f32.mrf.mxu1 }
  0xfa   : > { %3453 = vst [vmem:[#allocation15_spill] sm:$0xff] %v2907_v50  ;;  %3454 = vst [vmem:[#allocation16_spill] sm:$0xff] %v2910_v1  ;;  %v2912_v31 = vadd.f32 %v451_v54, %v345_v2  ;;  %v2915_v19 = vadd.f32 %v524_v17, %v2863_v62 }
  0xfb   : > { %v455_v38 = vpop.f32.mrf.mxu0  ;;  %v528_v58 = vpop.f32.mrf.mxu1 }
  0xfc   : > { %3455 = vst [vmem:[#allocation17_spill] sm:$0xff] %v2912_v31  ;;  %3456 = vst [vmem:[#allocation18_spill] sm:$0xff] %v2915_v19  ;;  %v2917_v52 = vadd.f32 %v455_v38, %v341_v61  ;;  %v2920_v49 = vadd.f32 %v528_v58, %v2854_v57 }
  0xfd   : > { %v457_v51 = vpop.f32.mrf.mxu0  ;;  %v530_v0 = vpop.f32.mrf.mxu1 }
  0xfe   : > { %3457 = vst [vmem:[#allocation19_spill] sm:$0xff] %v2917_v52  ;;  %3458 = vst [vmem:[#allocation20_spill] sm:$0xff] %v2920_v49  ;;  %v2922_v50 = vadd.f32 %v457_v51, %v345_v2  ;;  %v2925_v63 = vadd.f32 %v530_v0, %v2863_v62  ;;  %v426_v52 = vadd.f32 %v2850_v55, %v341_v61 }
  0xff   : > { %v459_v1 = vpop.f32.mrf.mxu0  ;;  %v532_v54 = vpop.f32.mrf.mxu1  ;;  %v428_v0 = vadd.f32 %v2857_v59, %v345_v2  ;;  %v499_v59 = vadd.f32 %v2852_v56, %v2854_v57 }
 0x100   : > { %3459 = vst [vmem:[#allocation21_spill] sm:$0xff] %v2922_v50  ;;  %3460 = vst [vmem:[#allocation22_spill] sm:$0xff] %v2925_v63  ;;  %v2927_v31 = vadd.f32 %v459_v1, %v341_v61  ;;  %v2930_v17 = vadd.f32 %v532_v54, %v2854_v57  ;;  %v501_v61 = vadd.f32 %v2859_v60, %v2863_v62 }
 0x101   : > { %v461_v19 = vpop.f32.mrf.mxu0  ;;  %v534_v38 = vpop.f32.mrf.mxu1 }
 0x102   : > { %3461 = vst [vmem:[#allocation23_spill] sm:$0xff] %v2927_v31  ;;  %3462 = vst [vmem:[#allocation24_spill] sm:$0xff] %v2930_v17  ;;  %v2933_v58 = vadd.f32 %v461_v19, %v345_v2  ;;  %v2936_v49 = vadd.f32 %v534_v38, %v2863_v62 }
 0x103   : > { %v763_v51 = vpop.f32.mrf.mxu0 }
 0x104   : > { %v811_v63 = vadd.f32 %v763_v51, %v426_v52  ;;  %v804_v50 = vpop.f32.mrf.mxu1 }
 0x105   : > { %v765_v6 = vpop.f32.mrf.mxu0  ;;  %v813_v38 = vadd.f32 %v804_v50, %v499_v59 }
 0x106   : > { %v2085_v1 = vmul.f32 -1.442695, %v811_v63  ;;  %v812_v31 = vadd.f32 %v765_v6, %v428_v0  ;;  %v806_v5 = vpop.f32.mrf.mxu1 }
 0x107   : > { %v767_v54 = vpop.f32.mrf.mxu0  ;;  %v814_v19 = vadd.f32 %v806_v5, %v501_v61 }
 0x108   : > { %2286 = vpow2.f32 %v2085_v1  ;;  %v2086_v17 = vmul.f32 -1.442695, %v812_v31  ;;  %v808_v53 = vpop.f32.mrf.mxu1  ;;  %v3463_v54 = vmov 0  }
 0x109   : > { %v768_v27 = vpop.f32.mrf.mxu0  ;;  %v2087_v52 = vmul.f32 -1.442695, %v814_v19 }
 0x10a   : > { %2288 = vpow2.f32 %v2086_v17  ;;  %v809_v55 = vpop.f32.mrf.mxu1 }
 0x10b   : > { %2290 = vpow2.f32 %v2087_v52 }
 0x115   : > { %v2287_v2 = vpop.eup %2286 }
 0x116   : > { %v818_v63 = vadd.f32 1.0, %v2287_v2 }
 0x117   : > { %v2289_v6 = vpop.eup %2288 }
 0x118   : > { %2292 = vrcp.f32 %v818_v63  ;;  %v824_v51 = vadd.f32 1.0, %v2289_v6  ;;  %v2291_v27 = vpop.eup %2290 }
 0x119   : > { %2294 = vtanh.f32 %v813_v38  ;;  %v831_v0 = vadd.f32 1.0, %v2291_v27 }
 0x11a   : > { %2296 = vrcp.f32 %v824_v51 }
 0x11b   : > { %2298 = vrcp.f32 %v831_v0 }
 0x125   : > { %v2293_v53 = vpop.eup %2292 }
 0x126   : > { %v2295_v31 = vpop.eup %2294 }
 0x127   : > { %v2297_v17 = vpop.eup %2296  ;;  %v835_v62 = vmul.f32 %v2295_v31, %v2293_v53 }
 0x128   : > { %v834_v60 = vmul.f32 0.0, %v2297_v17  ;;  %v2299_v50 = vpop.eup %2298 }
 0x12a   : > { %v2943_v5 = vadd.f32 %v835_v62, %v834_v60 }
 0x12c   : > { %2300 = vtanh.f32 %v2943_v5 }
 0x139   : > { %v2301_v56 = vpop.eup %2300 }
 0x13a   : > { %v838_v57 = vmul.f32 %v2301_v56, %v2299_v50 }
 0x13c   : > { %v839_v1 = vpack.c.bf16 %v838_v57, %v838_v57 }
 0x13e   : > { %873 = vmatmul.mubr.bf16.vlgmr.msra.gmra.mxu0 %v839_v1  ;;  %914 = vmatmul.mubr.bf16.vlgmr.msra.gmra.mxu1 %v839_v1 }
 0x13f   : > { %952 = vmatpush1.bf16.msra.mxu0 %v2603_v10  ;;  %993 = vmatpush1.bf16.msra.mxu1 %v2608_v11 }
 0x140   : > { %953 = vmatprep.subr.bf16.mxu0 %v2614_v12  ;;  %994 = vmatprep.subr.bf16.mxu1 %v2621_v13 }
 0x141   : > { %983 = vmatprep.mubr.bf16.mxu0 %v3463_v54  ;;  %1024 = vmatprep.mubr.bf16.mxu1 %v3463_v54 }
 0x143   : > { %954 = vmatpush1.bf16.msra.mxu0 %v2628_v14  ;;  %995 = vmatpush1.bf16.msra.mxu1 %v2633_v15 }
 0x144   : > { %955 = vmatprep.subr.bf16.mxu0 %v2644_v18  ;;  %996 = vmatprep.subr.bf16.mxu1 %v2650_v20 }
 0x147   : > { %956 = vmatpush1.bf16.msra.mxu0 %v2655_v21  ;;  %997 = vmatpush1.bf16.msra.mxu1 %v2661_v22 }
 0x148   : > { %957 = vmatprep.subr.bf16.mxu0 %v2668_v23  ;;  %998 = vmatprep.subr.bf16.mxu1 %v2674_v24 }
 0x14b   : > { %958 = vmatpush1.bf16.msra.mxu0 %v2679_v25  ;;  %999 = vmatpush1.bf16.msra.mxu1 %v2692_v28 }
 0x14c   : > { %959 = vmatprep.subr.bf16.mxu0 %v2697_v29  ;;  %1000 = vmatprep.subr.bf16.mxu1 %v2704_v30 }
 0x14f   : > { %960 = vmatpush1.bf16.msra.mxu0 %v2710_v32  ;;  %1001 = vmatpush1.bf16.msra.mxu1 %v2715_v33 }
 0x150   : > { %961 = vmatprep.subr.bf16.mxu0 %v2722_v34  ;;  %1002 = vmatprep.subr.bf16.mxu1 %v2728_v35 }
 0x153   : > { %962 = vmatpush1.bf16.msra.mxu0 %v2735_v36  ;;  %1003 = vmatpush1.bf16.msra.mxu1 %v2740_v37 }
 0x154   : > { %963 = vmatprep.subr.bf16.mxu0 %v2751_v40  ;;  %1004 = vmatprep.subr.bf16.mxu1 %v2758_v41 }
 0x157   : > { %964 = vmatpush1.bf16.msra.mxu0 %v2763_v42  ;;  %1005 = vmatpush1.bf16.msra.mxu1 %v2768_v44 }
 0x158   : > { %965 = vmatprep.subr.bf16.mxu0 %v2773_v45  ;;  %1006 = vmatprep.subr.bf16.mxu1 %v2779_v46 }
 0x15b   : > { %966 = vmatpush1.bf16.msra.mxu0 %v2787_v47  ;;  %1007 = vmatpush1.bf16.msra.mxu1 %v2794_v48 }
 0x15c   : > { %1062 = vmatprep.subr.bf16.mxu0 %v2593_v8  ;;  %1103 = vmatprep.subr.bf16.mxu1 %v2598_v9 }
 0x1fe   : > { %v874_v55 = vpop.f32.mrf.mxu0  ;;  %v915_v61 = vpop.f32.mrf.mxu1 }
 0x1ff   : > { %v922_v19 = vadd.f32 %v874_v55, %v2867_v3  ;;  %v924_v17 = vadd.f32 %v915_v61, %v2870_v4 }
 0x200   : > { %v876_v59 = vpop.f32.mrf.mxu0  ;;  %v917_v52 = vpop.f32.mrf.mxu1 }
 0x201   : > { %v2088_v2 = vmul.f32 -1.442695, %v922_v19  ;;  %v923_v38 = vadd.f32 %v876_v59, %v2872_v7  ;;  %v925_v31 = vadd.f32 %v917_v52, %v2875_v16 }
 0x202   : > { %v878_v63 = vpop.f32.mrf.mxu0  ;;  %v919_v6 = vpop.f32.mrf.mxu1 }
 0x203   : > { %2302 = vpow2.f32 %v2088_v2  ;;  %v2089_v51 = vmul.f32 -1.442695, %v923_v38  ;;  %v2090_v0 = vmul.f32 -1.442695, %v925_v31 }
 0x204   : > { %v879_v27 = vpop.f32.mrf.mxu0  ;;  %v920_v53 = vpop.f32.mrf.mxu1 }
 0x205   : > { %2304 = vpow2.f32 %v2089_v51 }
 0x206   : > { %2306 = vtanh.f32 %v924_v17 }
 0x207   : > { %2308 = vpow2.f32 %v2090_v0 }
 0x210   : > { %v2303_v60 = vpop.eup %2302 }
 0x211   : > { %v929_v62 = vadd.f32 1.0, %v2303_v60 }
 0x212   : > { %v2305_v3 = vpop.eup %2304 }
 0x213   : > { %2310 = vrcp.f32 %v929_v62  ;;  %v935_v50 = vadd.f32 1.0, %v2305_v3  ;;  %v2307_v7 = vpop.eup %2306 }
 0x214   : > { %v2309_v56 = vpop.eup %2308 }
 0x215   : > { %2312 = vrcp.f32 %v935_v50  ;;  %v942_v19 = vadd.f32 1.0, %v2309_v56  ;;  %v3464_v50 = vld [vmem:[#allocation6_spill] sm:$0xff] }
 0x217   : > { %2314 = vrcp.f32 %v942_v19 }
 0x220   : > { %v2311_v57 = vpop.eup %2310 }
 0x221   : > { %v946_v1 = vmul.f32 %v2311_v57, %v2307_v7 }
 0x222   : > { %v2313_v55 = vpop.eup %2312 }
 0x223   : > { %v945_v59 = vmul.f32 %v2313_v55, %v2943_v5 }
 0x224   : > { %v2315_v4 = vpop.eup %2314 }
 0x225   : > { %v2985_v16 = vadd.f32 %v946_v1, %v945_v59 }
 0x227   : > { %2316 = vtanh.f32 %v2985_v16 }
 0x234   : > { %v2317_v61 = vpop.eup %2316 }
 0x235   : > { %v949_v52 = vmul.f32 %v2317_v61, %v2315_v4 }
 0x237   : > { %v950_v2 = vpack.c.bf16 %v949_v52, %v949_v52 }
 0x239   : > { %984 = vmatmul.mubr.bf16.vlgmr.msra.gmra.mxu0 %v950_v2  ;;  %1025 = vmatmul.mubr.bf16.vlgmr.msra.gmra.mxu1 %v950_v2 }
 0x23a   : > { %1063 = vmatpush1.bf16.msra.mxu0 %v2603_v10  ;;  %1104 = vmatpush1.bf16.msra.mxu1 %v2608_v11 }
 0x23b   : > { %1064 = vmatprep.subr.bf16.mxu0 %v2614_v12  ;;  %1105 = vmatprep.subr.bf16.mxu1 %v2621_v13 }
 0x23c   : > { %1094 = vmatprep.mubr.bf16.mxu0 %v3463_v54  ;;  %1135 = vmatprep.mubr.bf16.mxu1 %v3463_v54 }
 0x23e   : > { %1065 = vmatpush1.bf16.msra.mxu0 %v2628_v14  ;;  %1106 = vmatpush1.bf16.msra.mxu1 %v2633_v15 }
 0x23f   : > { %1066 = vmatprep.subr.bf16.mxu0 %v2644_v18  ;;  %1107 = vmatprep.subr.bf16.mxu1 %v2650_v20 }
 0x242   : > { %1067 = vmatpush1.bf16.msra.mxu0 %v2655_v21  ;;  %1108 = vmatpush1.bf16.msra.mxu1 %v2661_v22 }
 0x243   : > { %1068 = vmatprep.subr.bf16.mxu0 %v2668_v23  ;;  %1109 = vmatprep.subr.bf16.mxu1 %v2674_v24 }
 0x246   : > { %1069 = vmatpush1.bf16.msra.mxu0 %v2679_v25  ;;  %1110 = vmatpush1.bf16.msra.mxu1 %v2692_v28 }
 0x247   : > { %1070 = vmatprep.subr.bf16.mxu0 %v2697_v29  ;;  %1111 = vmatprep.subr.bf16.mxu1 %v2704_v30 }
 0x24a   : > { %1071 = vmatpush1.bf16.msra.mxu0 %v2710_v32  ;;  %1112 = vmatpush1.bf16.msra.mxu1 %v2715_v33 }
 0x24b   : > { %1072 = vmatprep.subr.bf16.mxu0 %v2722_v34  ;;  %1113 = vmatprep.subr.bf16.mxu1 %v2728_v35 }
 0x24e   : > { %1073 = vmatpush1.bf16.msra.mxu0 %v2735_v36  ;;  %1114 = vmatpush1.bf16.msra.mxu1 %v2740_v37 }
 0x24f   : > { %1074 = vmatprep.subr.bf16.mxu0 %v2751_v40  ;;  %1115 = vmatprep.subr.bf16.mxu1 %v2758_v41 }
 0x252   : > { %1075 = vmatpush1.bf16.msra.mxu0 %v2763_v42  ;;  %1116 = vmatpush1.bf16.msra.mxu1 %v2768_v44 }
 0x253   : > { %1076 = vmatprep.subr.bf16.mxu0 %v2773_v45  ;;  %1117 = vmatprep.subr.bf16.mxu1 %v2779_v46 }
 0x256   : > { %1077 = vmatpush1.bf16.msra.mxu0 %v2787_v47  ;;  %1118 = vmatpush1.bf16.msra.mxu1 %v2794_v48 }
 0x257   : > { %1173 = vmatprep.subr.bf16.mxu0 %v2593_v8  ;;  %1214 = vmatprep.subr.bf16.mxu1 %v2598_v9 }
 0x2f9   : > { %v985_v5 = vpop.f32.mrf.mxu0  ;;  %v1026_v38 = vpop.f32.mrf.mxu1 }
 0x2fa   : > { %v1033_v63 = vadd.f32 %v985_v5, %v2877_v26  ;;  %v1035_v7 = vadd.f32 %v1026_v38, %v3464_v50 }
 0x2fb   : > { %v987_v6 = vpop.f32.mrf.mxu0  ;;  %v1028_v51 = vpop.f32.mrf.mxu1 }
 0x2fc   : > { %v2091_v27 = vmul.f32 -1.442695, %v1033_v63  ;;  %v1034_v53 = vadd.f32 %v987_v6, %v2882_v39  ;;  %v1036_v3 = vadd.f32 %v1028_v51, %v2885_v43  ;;  %v3467_v51 = vld [vmem:[#allocation10_spill] sm:$0xff] }
 0x2fd   : > { %v989_v31 = vpop.f32.mrf.mxu0  ;;  %v1030_v17 = vpop.f32.mrf.mxu1 }
 0x2fe   : > { %2318 = vpow2.f32 %v2091_v27  ;;  %v2092_v0 = vmul.f32 -1.442695, %v1034_v53  ;;  %v2093_v56 = vmul.f32 -1.442695, %v1036_v3  ;;  %v3468_v27 = vld [vmem:[#allocation8_spill] sm:$0xff] }
 0x2ff   : > { %v990_v60 = vpop.f32.mrf.mxu0  ;;  %v1031_v62 = vpop.f32.mrf.mxu1 }
 0x300   : > { %2320 = vpow2.f32 %v2092_v0 }
 0x301   : > { %2322 = vtanh.f32 %v1035_v7 }
 0x302   : > { %2324 = vpow2.f32 %v2093_v56 }
 0x30b   : > { %v2319_v57 = vpop.eup %2318 }
 0x30c   : > { %v1040_v1 = vadd.f32 1.0, %v2319_v57 }
 0x30d   : > { %v2321_v26 = vpop.eup %2320 }
 0x30e   : > { %2326 = vrcp.f32 %v1040_v1  ;;  %v1046_v55 = vadd.f32 1.0, %v2321_v26  ;;  %v2323_v39 = vpop.eup %2322 }
 0x30f   : > { %v2325_v19 = vpop.eup %2324 }
 0x310   : > { %2328 = vrcp.f32 %v1046_v55  ;;  %v1053_v52 = vadd.f32 1.0, %v2325_v19 }
 0x312   : > { %2330 = vrcp.f32 %v1053_v52  ;;  %v3087_v52 = vld [vmem:[%s3429_s2 + $0xc4] ss:$16 sps:$4 sm:$0xff]  }
 0x31b   : > { %v2327_v59 = vpop.eup %2326 }
 0x31c   : > { %v1057_v4 = vmul.f32 %v2327_v59, %v2323_v39 }
 0x31d   : > { %v2329_v61 = vpop.eup %2328 }
 0x31e   : > { %v1056_v2 = vmul.f32 %v2329_v61, %v2985_v16  ;;  %v3081_v61 = vld [vmem:[%s3429_s2 + $0xe8] ss:$16 sps:$4 sm:$0xff]  }
 0x31f   : > { %v2331_v5 = vpop.eup %2330 }
 0x320   : > { %v3027_v43 = vadd.f32 %v1057_v4, %v1056_v2  ;;  %v3075_v4 = vld [vmem:[%s3429_s2 + $0xe0] ss:$16 sps:$4 sm:$0xff]   ;;  %v3093_v2 = vld [vmem:[%s3429_s2 + $0xcc] ss:$16 sps:$4 sm:$0xff]  }
 0x322   : > { %2332 = vtanh.f32 %v3027_v43 }
 0x32f   : > { %v2333_v38 = vpop.eup %2332 }
 0x330   : > { %v1060_v63 = vmul.f32 %v2333_v38, %v2331_v5  ;;  %v3107_v5 = vld [vmem:[%s3429_s2 + $0xc8] ss:$16 sps:$4 sm:$0xff]   ;;  %v3113_v38 = vld [vmem:[%s3429_s2 + $0xa4] ss:$16 sps:$4 sm:$0xff]  }
 0x332   : > { %v1061_v6 = vpack.c.bf16 %v1060_v63, %v1060_v63  ;;  %v3119_v63 = vld [vmem:[%s3429_s2 + $0xac] ss:$16 sps:$4 sm:$0xff]  }
 0x334   : > { %1095 = vmatmul.mubr.bf16.vlgmr.msra.gmra.mxu0 %v1061_v6  ;;  %1136 = vmatmul.mubr.bf16.vlgmr.msra.gmra.mxu1 %v1061_v6  ;;  %v3125_v6 = vld [vmem:[%s3429_s2 + $0xa0] ss:$16 sps:$4 sm:$0xff]  }
 0x335   : > { %1174 = vmatpush1.bf16.msra.mxu0 %v2603_v10  ;;  %1215 = vmatpush1.bf16.msra.mxu1 %v2608_v11 }
 0x336   : > { %1175 = vmatprep.subr.bf16.mxu0 %v2614_v12  ;;  %1216 = vmatprep.subr.bf16.mxu1 %v2621_v13  ;;  %v3465_v12 = vld [vmem:[#allocation7_spill] sm:$0xff] }
 0x337   : > { %1205 = vmatprep.mubr.bf16.mxu0 %v3463_v54  ;;  %1246 = vmatprep.mubr.bf16.mxu1 %v3463_v54 }
 0x339   : > { %1176 = vmatpush1.bf16.msra.mxu0 %v2628_v14  ;;  %1217 = vmatpush1.bf16.msra.mxu1 %v2633_v15 }
 0x33a   : > { %1177 = vmatprep.subr.bf16.mxu0 %v2644_v18  ;;  %1218 = vmatprep.subr.bf16.mxu1 %v2650_v20  ;;  %v3466_v20 = vld [vmem:[#allocation9_spill] sm:$0xff] }
 0x33d   : > { %1178 = vmatpush1.bf16.msra.mxu0 %v2655_v21  ;;  %1219 = vmatpush1.bf16.msra.mxu1 %v2661_v22 }
 0x33e   : > { %1179 = vmatprep.subr.bf16.mxu0 %v2668_v23  ;;  %1220 = vmatprep.subr.bf16.mxu1 %v2674_v24 }
 0x341   : > { %1180 = vmatpush1.bf16.msra.mxu0 %v2679_v25  ;;  %1221 = vmatpush1.bf16.msra.mxu1 %v2692_v28 }
 0x342   : > { %1181 = vmatprep.subr.bf16.mxu0 %v2697_v29  ;;  %1222 = vmatprep.subr.bf16.mxu1 %v2704_v30 }
 0x345   : > { %1182 = vmatpush1.bf16.msra.mxu0 %v2710_v32  ;;  %1223 = vmatpush1.bf16.msra.mxu1 %v2715_v33 }
 0x346   : > { %1183 = vmatprep.subr.bf16.mxu0 %v2722_v34  ;;  %1224 = vmatprep.subr.bf16.mxu1 %v2728_v35 }
 0x349   : > { %1184 = vmatpush1.bf16.msra.mxu0 %v2735_v36  ;;  %1225 = vmatpush1.bf16.msra.mxu1 %v2740_v37 }
 0x34a   : > { %1185 = vmatprep.subr.bf16.mxu0 %v2751_v40  ;;  %1226 = vmatprep.subr.bf16.mxu1 %v2758_v41 }
 0x34d   : > { %1186 = vmatpush1.bf16.msra.mxu0 %v2763_v42  ;;  %1227 = vmatpush1.bf16.msra.mxu1 %v2768_v44 }
 0x34e   : > { %1187 = vmatprep.subr.bf16.mxu0 %v2773_v45  ;;  %1228 = vmatprep.subr.bf16.mxu1 %v2779_v46 }
 0x351   : > { %1188 = vmatpush1.bf16.msra.mxu0 %v2787_v47  ;;  %1229 = vmatpush1.bf16.msra.mxu1 %v2794_v48 }
 0x352   : > { %1284 = vmatprep.subr.bf16.mxu0 %v2593_v8  ;;  %1325 = vmatprep.subr.bf16.mxu1 %v2598_v9 }
 0x3f4   : > { %v1096_v10 = vpop.f32.mrf.mxu0  ;;  %v1137_v11 = vpop.f32.mrf.mxu1 }
 0x3f5   : > { %v1144_v13 = vadd.f32 %v1096_v10, %v3465_v12  ;;  %v1146_v9 = vadd.f32 %v1137_v11, %v3468_v27  ;;  %v3131_v10 = vld [vmem:[%s3429_s2 + $0xa8] ss:$16 sps:$4 sm:$0xff]   ;;  %v3137_v11 = vld [vmem:[%s3429_s2 + $0x84] ss:$16 sps:$4 sm:$0xff]   ;;  %v3143_v12 = vld [vmem:[%s3429_s2 + $0x8c] ss:$16 sps:$4 sm:$0xff]  }
 0x3f6   : > { %v1098_v14 = vpop.f32.mrf.mxu0  ;;  %v1139_v15 = vpop.f32.mrf.mxu1 }
 0x3f7   : > { %v2094_v18 = vmul.f32 -1.442695, %v1144_v13  ;;  %v1145_v21 = vadd.f32 %v1098_v14, %v3466_v20  ;;  %v1147_v8 = vadd.f32 %v1139_v15, %v3467_v51  ;;  %v3149_v13 = vld [vmem:[%s3429_s2 + $0x80] ss:$16 sps:$4 sm:$0xff]   ;;  %v3472_v15 = vld [vmem:[#allocation12_spill] sm:$0xff] }
 0x3f8   : > { %v1100_v22 = vpop.f32.mrf.mxu0  ;;  %v1141_v23 = vpop.f32.mrf.mxu1 }
 0x3f9   : > { %2334 = vpow2.f32 %v2094_v18  ;;  %v2095_v24 = vmul.f32 -1.442695, %v1145_v21  ;;  %v2096_v53 = vmul.f32 -1.442695, %v1147_v8 }
 0x3fa   : > { %v1101_v25 = vpop.f32.mrf.mxu0  ;;  %v1142_v16 = vpop.f32.mrf.mxu1 }
 0x3fb   : > { %2336 = vpow2.f32 %v2095_v24 }
 0x3fc   : > { %2338 = vtanh.f32 %v1146_v9 }
 0x3fd   : > { %2340 = vpow2.f32 %v2096_v53 }
 0x406   : > { %v2335_v31 = vpop.eup %2334 }
 0x407   : > { %v1151_v17 = vadd.f32 1.0, %v2335_v31 }
 0x408   : > { %v2337_v0 = vpop.eup %2336 }
 0x409   : > { %2342 = vrcp.f32 %v1151_v17  ;;  %v1157_v60 = vadd.f32 1.0, %v2337_v0  ;;  %v2339_v62 = vpop.eup %2338 }
 0x40a   : > { %v2341_v3 = vpop.eup %2340 }
 0x40b   : > { %2344 = vrcp.f32 %v1157_v60  ;;  %v1164_v57 = vadd.f32 1.0, %v2341_v3  ;;  %v3207_v3 = vld [vmem:[%s3429_s2 + $0x88] ss:$16 sps:$4 sm:$0xff]  }
 0x40d   : > { %2346 = vrcp.f32 %v1164_v57  ;;  %v3231_v57 = vld [vmem:[%s3429_s2 + $0x68] ss:$16 sps:$4 sm:$0xff]  }
 0x416   : > { %v2343_v50 = vpop.eup %2342 }
 0x417   : > { %v1168_v7 = vmul.f32 %v2343_v50, %v2339_v62  ;;  %v3213_v50 = vld [vmem:[%s3429_s2 + $0x64] ss:$16 sps:$4 sm:$0xff]  }
 0x418   : > { %v2345_v56 = vpop.eup %2344 }
 0x419   : > { %v1167_v1 = vmul.f32 %v2345_v56, %v3027_v43  ;;  %v3101_v43 = vld [vmem:[%s3429_s2 + $0xc0] ss:$16 sps:$4 sm:$0xff]  }
 0x41a   : > { %v2347_v55 = vpop.eup %2346  ;;  %v3225_v56 = vld [vmem:[%s3429_s2 + $0x60] ss:$16 sps:$4 sm:$0xff]  }
 0x41b   : > { %v3069_v26 = vadd.f32 %v1168_v7, %v1167_v1  ;;  %v3219_v7 = vld [vmem:[%s3429_s2 + $0x6c] ss:$16 sps:$4 sm:$0xff]   ;;  %v3237_v1 = vld [vmem:[%s3429_s2 + $0x44] ss:$16 sps:$4 sm:$0xff]  }
 0x41d   : > { %2348 = vtanh.f32 %v3069_v26 }
 0x42a   : > { %v2349_v39 = vpop.eup %2348 }
 0x42b   : > { %v1171_v19 = vmul.f32 %v2349_v39, %v2347_v55  ;;  %v3249_v55 = vld [vmem:[%s3429_s2 + $0x40] ss:$16 sps:$4 sm:$0xff]   ;;  %v3255_v39 = vld [vmem:[%s3429_s2 + $0x48] ss:$16 sps:$4 sm:$0xff]  }
 0x42d   : > { %v1172_v59 = vpack.c.bf16 %v1171_v19, %v1171_v19  ;;  %v3261_v19 = vld [vmem:[%s3429_s2 + $0x24] ss:$16 sps:$4 sm:$0xff]  }
 0x42f   : > { %1206 = vmatmul.mubr.bf16.vlgmr.msra.gmra.mxu0 %v1172_v59  ;;  %1247 = vmatmul.mubr.bf16.vlgmr.msra.gmra.mxu1 %v1172_v59  ;;  %v3267_v59 = vld [vmem:[%s3429_s2 + $0x2c] ss:$16 sps:$4 sm:$0xff]  }
 0x430   : > { %1285 = vmatpush1.bf16.msra.mxu0 %v3075_v4  ;;  %1326 = vmatpush1.bf16.msra.mxu1 %v3081_v61 }
 0x431   : > { %1286 = vmatprep.subr.bf16.mxu0 %v3087_v52  ;;  %1327 = vmatprep.subr.bf16.mxu1 %v3093_v2 }
 0x432   : > { %1316 = vmatprep.mubr.bf16.mxu0 %v3463_v54  ;;  %1357 = vmatprep.mubr.bf16.mxu1 %v3463_v54 }
 0x434   : > { %1287 = vmatpush1.bf16.msra.mxu0 %v3101_v43  ;;  %1328 = vmatpush1.bf16.msra.mxu1 %v3107_v5 }
 0x435   : > { %1288 = vmatprep.subr.bf16.mxu0 %v3113_v38  ;;  %1329 = vmatprep.subr.bf16.mxu1 %v3119_v63 }
 0x438   : > { %1289 = vmatpush1.bf16.msra.mxu0 %v3125_v6  ;;  %1330 = vmatpush1.bf16.msra.mxu1 %v3131_v10 }
 0x439   : > { %1290 = vmatprep.subr.bf16.mxu0 %v3137_v11  ;;  %1331 = vmatprep.subr.bf16.mxu1 %v3143_v12 }
 0x43c   : > { %1291 = vmatpush1.bf16.msra.mxu0 %v3149_v13  ;;  %1332 = vmatpush1.bf16.msra.mxu1 %v2692_v28  ;;  %v3172_v28 = vld [vmem:[%s3429_s2 + $0xe4] ss:$16 sps:$4 sm:$0xff]  }
 0x43d   : > { %1292 = vmatprep.subr.bf16.mxu0 %v2697_v29  ;;  %1333 = vmatprep.subr.bf16.mxu1 %v2704_v30  ;;  %v3178_v29 = vld [vmem:[%s3429_s2 + $0xec] ss:$16 sps:$4 sm:$0xff]  }
 0x440   : > { %1293 = vmatpush1.bf16.msra.mxu0 %v2710_v32  ;;  %1334 = vmatpush1.bf16.msra.mxu1 %v2715_v33  ;;  %v3469_v33 = vld [vmem:[#allocation11_spill] sm:$0xff] }
 0x441   : > { %1294 = vmatprep.subr.bf16.mxu0 %v2722_v34  ;;  %1335 = vmatprep.subr.bf16.mxu1 %v2728_v35 }
 0x444   : > { %1295 = vmatpush1.bf16.msra.mxu0 %v2735_v36  ;;  %1336 = vmatpush1.bf16.msra.mxu1 %v2740_v37 }
 0x445   : > { %1296 = vmatprep.subr.bf16.mxu0 %v2751_v40  ;;  %1337 = vmatprep.subr.bf16.mxu1 %v2758_v41  ;;  %v3470_v40 = vld [vmem:[#allocation13_spill] sm:$0xff] }
 0x448   : > { %1297 = vmatpush1.bf16.msra.mxu0 %v2763_v42  ;;  %1338 = vmatpush1.bf16.msra.mxu1 %v2768_v44 }
 0x449   : > { %1298 = vmatprep.subr.bf16.mxu0 %v2773_v45  ;;  %1339 = vmatprep.subr.bf16.mxu1 %v2779_v46 }
 0x44c   : > { %1299 = vmatpush1.bf16.msra.mxu0 %v2787_v47  ;;  %1340 = vmatpush1.bf16.msra.mxu1 %v2794_v48  ;;  %v3471_v48 = vld [vmem:[#allocation14_spill] sm:$0xff] }
 0x44d   : > { %1395 = vmatprep.subr.bf16.mxu0 %v3172_v28  ;;  %1436 = vmatprep.subr.bf16.mxu1 %v3178_v29 }
 0x4ef   : > { %v1207_v30 = vpop.f32.mrf.mxu0  ;;  %v1248_v32 = vpop.f32.mrf.mxu1 }
 0x4f0   : > { %v1255_v34 = vadd.f32 %v1207_v30, %v3469_v33  ;;  %v1257_v18 = vadd.f32 %v1248_v32, %v3472_v15  ;;  %v3273_v30 = vld [vmem:[%s3429_s2 + $0x20] ss:$16 sps:$4 sm:$0xff]   ;;  %v3279_v32 = vld [vmem:[%s3429_s2 + $0x28] ss:$16 sps:$4 sm:$0xff]   ;;  %v3285_v33 = vld [vmem:[%s3429_s2 + $0x4] ss:$16 sps:$4 sm:$0xff]  }
 0x4f1   : > { %v1209_v35 = vpop.f32.mrf.mxu0  ;;  %v1250_v36 = vpop.f32.mrf.mxu1 }
 0x4f2   : > { %v2097_v37 = vmul.f32 -1.442695, %v1255_v34  ;;  %v1256_v41 = vadd.f32 %v1209_v35, %v3470_v40  ;;  %v1258_v14 = vadd.f32 %v1250_v36, %v3471_v48  ;;  %v3291_v34 = vld [vmem:[%s3429_s2 + $0xc] ss:$16 sps:$4 sm:$0xff]   ;;  %v3297_v35 = vld [vmem:[%s3429_s2] ss:$16 sps:$4 sm:$0xff]  }
 0x4f3   : > { %v1211_v42 = vpop.f32.mrf.mxu0  ;;  %v1252_v44 = vpop.f32.mrf.mxu1  ;;  %v3303_v36 = vld [vmem:[%s3429_s2 + $0x8] ss:$16 sps:$4 sm:$0xff]  }
 0x4f4   : > { %2350 = vpow2.f32 %v2097_v37  ;;  %v2098_v45 = vmul.f32 -1.442695, %v1256_v41  ;;  %v2099_v20 = vmul.f32 -1.442695, %v1258_v14  ;;  %v3473_v41 = vld [vmem:[#allocation15_spill] sm:$0xff] }
 0x4f5   : > { %v1212_v46 = vpop.f32.mrf.mxu0  ;;  %v1253_v47 = vpop.f32.mrf.mxu1 }
 0x4f6   : > { %2352 = vpow2.f32 %v2098_v45  ;;  %v3474_v47 = vld [vmem:[#allocation17_spill] sm:$0xff] }
 0x4f7   : > { %2354 = vtanh.f32 %v1257_v18 }
 0x4f8   : > { %2356 = vpow2.f32 %v2099_v20 }
 0x501   : > { %v2351_v21 = vpop.eup %2350 }
 0x502   : > { %v1262_v22 = vadd.f32 1.0, %v2351_v21 }
 0x503   : > { %v2353_v23 = vpop.eup %2352 }
 0x504   : > { %2358 = vrcp.f32 %v1262_v22  ;;  %v1268_v24 = vadd.f32 1.0, %v2353_v23  ;;  %v2355_v25 = vpop.eup %2354  ;;  %v3475_v22 = vld [vmem:[#allocation18_spill] sm:$0xff]  ;;  %v3476_v23 = vld [vmem:[#allocation16_spill] sm:$0xff] }
 0x505   : > { %v2357_v16 = vpop.eup %2356 }
 0x506   : > { %2360 = vrcp.f32 %v1268_v24  ;;  %v1275_v9 = vadd.f32 1.0, %v2357_v16 }
 0x508   : > { %2362 = vrcp.f32 %v1275_v9 }
 0x511   : > { %v2359_v51 = vpop.eup %2358 }
 0x512   : > { %v1279_v8 = vmul.f32 %v2359_v51, %v2355_v25 }
 0x513   : > { %v2361_v27 = vpop.eup %2360 }
 0x514   : > { %v1278_v53 = vmul.f32 %v2361_v27, %v3069_v26  ;;  %v3243_v26 = vld [vmem:[%s3429_s2 + $0x4c] ss:$16 sps:$4 sm:$0xff]  }
 0x515   : > { %v2363_v17 = vpop.eup %2362 }
 0x516   : > { %v3186_v31 = vadd.f32 %v1279_v8, %v1278_v53 }
 0x518   : > { %2364 = vtanh.f32 %v3186_v31 }
 0x525   : > { %v2365_v0 = vpop.eup %2364 }
 0x526   : > { %v1282_v60 = vmul.f32 %v2365_v0, %v2363_v17 }
 0x528   : > { %v1283_v62 = vpack.c.bf16 %v1282_v60, %v1282_v60 }
 0x52a   : > { %1317 = vmatmul.mubr.bf16.vlgmr.msra.gmra.mxu0 %v1283_v62  ;;  %1358 = vmatmul.mubr.bf16.vlgmr.msra.gmra.mxu1 %v1283_v62 }
 0x52b   : > { %1396 = vmatpush1.bf16.msra.mxu0 %v3075_v4  ;;  %1437 = vmatpush1.bf16.msra.mxu1 %v3081_v61 }
 0x52c   : > { %1397 = vmatprep.subr.bf16.mxu0 %v3087_v52  ;;  %1438 = vmatprep.subr.bf16.mxu1 %v3093_v2 }
 0x52d   : > { %1427 = vmatprep.mubr.bf16.mxu0 %v3463_v54  ;;  %1468 = vmatprep.mubr.bf16.mxu1 %v3463_v54 }
 0x52f   : > { %1398 = vmatpush1.bf16.msra.mxu0 %v3101_v43  ;;  %1439 = vmatpush1.bf16.msra.mxu1 %v3107_v5 }
 0x530   : > { %1399 = vmatprep.subr.bf16.mxu0 %v3113_v38  ;;  %1440 = vmatprep.subr.bf16.mxu1 %v3119_v63 }
 0x533   : > { %1400 = vmatpush1.bf16.msra.mxu0 %v3125_v6  ;;  %1441 = vmatpush1.bf16.msra.mxu1 %v3131_v10 }
 0x534   : > { %1401 = vmatprep.subr.bf16.mxu0 %v3137_v11  ;;  %1442 = vmatprep.subr.bf16.mxu1 %v3143_v12 }
 0x537   : > { %1402 = vmatpush1.bf16.msra.mxu0 %v3149_v13  ;;  %1443 = vmatpush1.bf16.msra.mxu1 %v3207_v3 }
 0x538   : > { %1403 = vmatprep.subr.bf16.mxu0 %v3213_v50  ;;  %1444 = vmatprep.subr.bf16.mxu1 %v3219_v7 }
 0x53b   : > { %1404 = vmatpush1.bf16.msra.mxu0 %v3225_v56  ;;  %1445 = vmatpush1.bf16.msra.mxu1 %v3231_v57 }
 0x53c   : > { %1405 = vmatprep.subr.bf16.mxu0 %v3237_v1  ;;  %1446 = vmatprep.subr.bf16.mxu1 %v3243_v26 }
 0x53f   : > { %1406 = vmatpush1.bf16.msra.mxu0 %v3249_v55  ;;  %1447 = vmatpush1.bf16.msra.mxu1 %v3255_v39 }
 0x540   : > { %1407 = vmatprep.subr.bf16.mxu0 %v3261_v19  ;;  %1448 = vmatprep.subr.bf16.mxu1 %v3267_v59 }
 0x543   : > { %1408 = vmatpush1.bf16.msra.mxu0 %v3273_v30  ;;  %1449 = vmatpush1.bf16.msra.mxu1 %v3279_v32 }
 0x544   : > { %1409 = vmatprep.subr.bf16.mxu0 %v3285_v33  ;;  %1450 = vmatprep.subr.bf16.mxu1 %v3291_v34 }
 0x547   : > { %1410 = vmatpush1.bf16.msra.mxu0 %v3297_v35  ;;  %1451 = vmatpush1.bf16.msra.mxu1 %v3303_v36 }
 0x548   : > { %1506 = vmatprep.subr.bf16.mxu0 %v3172_v28  ;;  %1547 = vmatprep.subr.bf16.mxu1 %v3178_v29 }
 0x5ea   : > { %v1318_v37 = vpop.f32.mrf.mxu0  ;;  %v1359_v40 = vpop.f32.mrf.mxu1 }
 0x5eb   : > { %v1366_v42 = vadd.f32 %v1318_v37, %v3473_v41  ;;  %v1368_v29 = vadd.f32 %v1359_v40, %v3476_v23  ;;  %v2255_v23 = vld [vmem:[#allocation2 + $0x40] ss:$8 sps:$4 sm:$0xff]  }
 0x5ec   : > { %v1320_v44 = vpop.f32.mrf.mxu0  ;;  %v1361_v45 = vpop.f32.mrf.mxu1 }
 0x5ed   : > { %v2100_v46 = vmul.f32 -1.442695, %v1366_v42  ;;  %v1367_v48 = vadd.f32 %v1320_v44, %v3474_v47  ;;  %v1369_v28 = vadd.f32 %v1361_v45, %v3475_v22  ;;  %v2252_v22 = vld [vmem:[#allocation2 + $0x50] ss:$8 sps:$4 sm:$0xff]  }
 0x5ee   : > { %v1322_v14 = vpop.f32.mrf.mxu0  ;;  %v1363_v15 = vpop.f32.mrf.mxu1 }
 0x5ef   : > { %2366 = vpow2.f32 %v2100_v46  ;;  %v2101_v18 = vmul.f32 -1.442695, %v1367_v48  ;;  %v2102_v24 = vmul.f32 -1.442695, %v1369_v28  ;;  %v2248_v14 = vld [vmem:[#allocation2 + $0x74] ss:$8 sps:$4 sm:$0xff]  }
 0x5f0   : > { %v1323_v20 = vpop.f32.mrf.mxu0  ;;  %v1364_v21 = vpop.f32.mrf.mxu1  ;;  %v2246_v15 = vld [vmem:[#allocation2 + $0x70] ss:$8 sps:$4 sm:$0xff]   ;;  %v2257_v28 = vld [vmem:[#allocation2 + $0x44] ss:$8 sps:$4 sm:$0xff]  }
 0x5f1   : > { %2368 = vpow2.f32 %v2101_v18  ;;  %v2251_v18 = vld [vmem:[#allocation2 + $0x64] ss:$8 sps:$4 sm:$0xff]   ;;  %v2249_v20 = vld [vmem:[#allocation2 + $0x60] ss:$8 sps:$4 sm:$0xff]   ;;  %v2254_v21 = vld [vmem:[#allocation2 + $0x54] ss:$8 sps:$4 sm:$0xff]  }
 0x5f2   : > { %2370 = vtanh.f32 %v1368_v29  ;;  %v2260_v29 = vld [vmem:[#allocation2 + $0x34] ss:$8 sps:$4 sm:$0xff]  }
 0x5f3   : > { %2372 = vpow2.f32 %v2102_v24  ;;  %v2258_v24 = vld [vmem:[#allocation2 + $0x30] ss:$8 sps:$4 sm:$0xff]  }
 0x5fc   : > { %v2367_v25 = vpop.eup %2366 }
 0x5fd   : > { %v1373_v16 = vadd.f32 1.0, %v2367_v25  ;;  %v2261_v25 = vld [vmem:[#allocation2 + $0x20] ss:$8 sps:$4 sm:$0xff]  }
 0x5fe   : > { %v2369_v51 = vpop.eup %2368 }
 0x5ff   : > { %2374 = vrcp.f32 %v1373_v16  ;;  %v1379_v8 = vadd.f32 1.0, %v2369_v51  ;;  %v2371_v27 = vpop.eup %2370  ;;  %v2266_v16 = vld [vmem:[#allocation2 + $0x14] ss:$8 sps:$4 sm:$0xff]   ;;  %v2264_v51 = vld [vmem:[#allocation2 + $0x10] ss:$8 sps:$4 sm:$0xff]  }
 0x600   : > { %v2373_v9 = vpop.eup %2372 }
 0x601   : > { %2376 = vrcp.f32 %v1379_v8  ;;  %v1386_v60 = vadd.f32 1.0, %v2373_v9  ;;  %v2269_v8 = vld [vmem:[#allocation2 + $0x4] ss:$8 sps:$4 sm:$0xff]   ;;  %v2270_v9 = vld [vmem:[%s3433_s6 + $0x78] sm:$0xff]  }
 0x603   : > { %2378 = vrcp.f32 %v1386_v60  ;;  %v2274_v60 = vld [vmem:[%s3433_s6 + $0x68] sm:$0xff]  }
 0x60c   : > { %v2375_v53 = vpop.eup %2374 }
 0x60d   : > { %v1390_v17 = vmul.f32 %v2375_v53, %v2371_v27  ;;  %v2267_v27 = vld [vmem:[#allocation2] ss:$8 sps:$4 sm:$0xff]   ;;  %v2271_v53 = vld [vmem:[%s3433_s6 + $0x38] sm:$0xff]  }
 0x60e   : > { %v2377_v0 = vpop.eup %2376 }
 0x60f   : > { %v1389_v62 = vmul.f32 %v2377_v0, %v3186_v31  ;;  %v2273_v0 = vld [vmem:[%s3433_s6 + $0x30] sm:$0xff]  }
 0x610   : > { %v2379_v40 = vpop.eup %2378 }
 0x611   : > { %v3313_v37 = vadd.f32 %v1390_v17, %v1389_v62  ;;  %v2272_v17 = vld [vmem:[%s3433_s6 + $0x70] sm:$0xff]   ;;  %v2275_v62 = vld [vmem:[%s3433_s6 + $0x28] sm:$0xff]  }
 0x613   : > { %2380 = vtanh.f32 %v3313_v37 }
 0x620   : > { %v2381_v41 = vpop.eup %2380 }
 0x621   : > { %v1393_v42 = vmul.f32 %v2381_v41, %v2379_v40  ;;  %v2277_v40 = vld [vmem:[%s3433_s6 + $0x20] sm:$0xff]   ;;  %v2278_v41 = vld [vmem:[%s3433_s6 + $0x58] sm:$0xff]  }
 0x623   : > { %v1394_v44 = vpack.c.bf16 %v1393_v42, %v1393_v42  ;;  %v2279_v42 = vld [vmem:[%s3433_s6 + $0x18] sm:$0xff]  }
 0x625   : > { %1428 = vmatmul.mubr.bf16.vlgmr.msra.gmra.mxu0 %v1394_v44  ;;  %1469 = vmatmul.mubr.bf16.vlgmr.msra.gmra.mxu1 %v1394_v44  ;;  %v2280_v44 = vld [vmem:[%s3433_s6 + $0x50] sm:$0xff]  }
 0x626   : > { %1507 = vmatpush1.bf16.msra.mxu0 %v3075_v4  ;;  %1548 = vmatpush1.bf16.msra.mxu1 %v3081_v61 }
 0x627   : > { %1508 = vmatprep.subr.bf16.mxu0 %v3087_v52  ;;  %1549 = vmatprep.subr.bf16.mxu1 %v3093_v2  ;;  %v3477_v52 = vld [vmem:[#allocation19_spill] sm:$0xff] }
 0x628   : > { %1538 = vmatprep.mubr.bf16.mxu0 %v3463_v54  ;;  %1579 = vmatprep.mubr.bf16.mxu1 %v3463_v54 }
 0x62a   : > { %1509 = vmatpush1.bf16.msra.mxu0 %v3101_v43  ;;  %1550 = vmatpush1.bf16.msra.mxu1 %v3107_v5 }
 0x62b   : > { %1510 = vmatprep.subr.bf16.mxu0 %v3113_v38  ;;  %1551 = vmatprep.subr.bf16.mxu1 %v3119_v63  ;;  %v3478_v63 = vld [vmem:[#allocation21_spill] sm:$0xff] }
 0x62e   : > { %1511 = vmatpush1.bf16.msra.mxu0 %v3125_v6  ;;  %1552 = vmatpush1.bf16.msra.mxu1 %v3131_v10 }
 0x62f   : > { %1512 = vmatprep.subr.bf16.mxu0 %v3137_v11  ;;  %1553 = vmatprep.subr.bf16.mxu1 %v3143_v12 }
 0x632   : > { %1513 = vmatpush1.bf16.msra.mxu0 %v3149_v13  ;;  %1554 = vmatpush1.bf16.msra.mxu1 %v3207_v3  ;;  %v3479_v3 = vld [vmem:[#allocation22_spill] sm:$0xff] }
 0x633   : > { %1514 = vmatprep.subr.bf16.mxu0 %v3213_v50  ;;  %1555 = vmatprep.subr.bf16.mxu1 %v3219_v7  ;;  %v3480_v7 = vld [vmem:[#allocation20_spill] sm:$0xff] }
 0x636   : > { %1515 = vmatpush1.bf16.msra.mxu0 %v3225_v56  ;;  %1556 = vmatpush1.bf16.msra.mxu1 %v3231_v57 }
 0x637   : > { %1516 = vmatprep.subr.bf16.mxu0 %v3237_v1  ;;  %1557 = vmatprep.subr.bf16.mxu1 %v3243_v26 }
 0x63a   : > { %1517 = vmatpush1.bf16.msra.mxu0 %v3249_v55  ;;  %1558 = vmatpush1.bf16.msra.mxu1 %v3255_v39 }
 0x63b   : > { %1518 = vmatprep.subr.bf16.mxu0 %v3261_v19  ;;  %1559 = vmatprep.subr.bf16.mxu1 %v3267_v59 }
 0x63e   : > { %1519 = vmatpush1.bf16.msra.mxu0 %v3273_v30  ;;  %1560 = vmatpush1.bf16.msra.mxu1 %v3279_v32 }
 0x63f   : > { %1520 = vmatprep.subr.bf16.mxu0 %v3285_v33  ;;  %1561 = vmatprep.subr.bf16.mxu1 %v3291_v34 }
 0x642   : > { %1521 = vmatpush1.bf16.msra.mxu0 %v3297_v35  ;;  %1562 = vmatpush1.bf16.msra.mxu1 %v3303_v36 }
 0x643   : > { %1725 = vmatprep.subr.bf16.mxu0 %v2248_v14  ;;  %2145 = vmatprep.subr.bf16.mxu1 %v2270_v9  ;;  %v2285_v14 = vld [vmem:[%s3433_s6] sm:$0xff]  }
 0x6e5   : > { %v1429_v4 = vpop.f32.mrf.mxu0  ;;  %v1470_v61 = vpop.f32.mrf.mxu1 }
 0x6e6   : > { %v1477_v2 = vadd.f32 %v1429_v4, %v3477_v52  ;;  %v1479_v56 = vadd.f32 %v1470_v61, %v3480_v7  ;;  %v2281_v4 = vld [vmem:[%s3433_s6 + $0x10] sm:$0xff]  }
 0x6e7   : > { %v1431_v43 = vpop.f32.mrf.mxu0  ;;  %v1472_v5 = vpop.f32.mrf.mxu1 }
 0x6e8   : > { %v2103_v38 = vmul.f32 -1.442695, %v1477_v2  ;;  %v1478_v6 = vadd.f32 %v1431_v43, %v3478_v63  ;;  %v1480_v50 = vadd.f32 %v1472_v5, %v3479_v3  ;;  %v3481_v2 = vld [vmem:[#allocation23_spill] sm:$0xff] }
 0x6e9   : > { %v1433_v10 = vpop.f32.mrf.mxu0  ;;  %v1474_v11 = vpop.f32.mrf.mxu1 }
 0x6ea   : > { %2382 = vpow2.f32 %v2103_v38  ;;  %v2104_v12 = vmul.f32 -1.442695, %v1478_v6  ;;  %v2105_v57 = vmul.f32 -1.442695, %v1480_v50  ;;  %v3482_v50 = vld [vmem:[#allocation24_spill] sm:$0xff] }
 0x6eb   : > { %v1434_v13 = vpop.f32.mrf.mxu0  ;;  %v1475_v31 = vpop.f32.mrf.mxu1 }
 0x6ec   : > { %2384 = vpow2.f32 %v2104_v12 }
 0x6ed   : > { %2386 = vtanh.f32 %v1479_v56 }
 0x6ee   : > { %2388 = vpow2.f32 %v2105_v57 }
 0x6f7   : > { %v2383_v1 = vpop.eup %2382 }
 0x6f8   : > { %v1484_v26 = vadd.f32 1.0, %v2383_v1 }
 0x6f9   : > { %v2385_v55 = vpop.eup %2384 }
 0x6fa   : > { %2390 = vrcp.f32 %v1484_v26  ;;  %v1490_v39 = vadd.f32 1.0, %v2385_v55  ;;  %v2387_v19 = vpop.eup %2386 }
 0x6fb   : > { %v2389_v59 = vpop.eup %2388 }
 0x6fc   : > { %2392 = vrcp.f32 %v1490_v39  ;;  %v1497_v34 = vadd.f32 1.0, %v2389_v59 }
 0x6fe   : > { %2394 = vrcp.f32 %v1497_v34 }
 0x707   : > { %v2391_v30 = vpop.eup %2390 }
 0x708   : > { %v1501_v32 = vmul.f32 %v2391_v30, %v2387_v19 }
 0x709   : > { %v2393_v33 = vpop.eup %2392 }
 0x70a   : > { %v1500_v35 = vmul.f32 %v2393_v33, %v3313_v37  ;;  %v2276_v37 = vld [vmem:[%s3433_s6 + $0x60] sm:$0xff]  }
 0x70b   : > { %v2395_v45 = vpop.eup %2394 }
 0x70c   : > { %v3353_v36 = vadd.f32 %v1501_v32, %v1500_v35 }
 0x70e   : > { %2396 = vtanh.f32 %v3353_v36 }
 0x71b   : > { %v2397_v46 = vpop.eup %2396 }
 0x71c   : > { %v1504_v47 = vmul.f32 %v2397_v46, %v2395_v45 }
 0x71e   : > { %v1505_v48 = vpack.c.bf16 %v1504_v47, %v1504_v47  ;;  %v2282_v47 = vld [vmem:[%s3433_s6 + $0x48] sm:$0xff]  }
 0x720   : > { %1539 = vmatmul.mubr.bf16.vlgmr.msra.gmra.mxu0 %v1505_v48  ;;  %1580 = vmatmul.mubr.bf16.vlgmr.msra.gmra.mxu1 %v1505_v48  ;;  %v2283_v48 = vld [vmem:[%s3433_s6 + $0x8] sm:$0xff]  }
 0x721   : > { %1757 = vmatprep.mubr.bf16.mxu0 %v3463_v54  ;;  %1726 = vmatpush1.bf16.msra.mxu0 %v2246_v15  ;;  %v2263_v54 = vld [vmem:[#allocation2 + $0x24] ss:$8 sps:$4 sm:$0xff]   ;;  %v1633_v15 = vld [vmem:[%s3432_s5] sm:$0x3] }
 0x722   : > { %1727 = vmatprep.subr.bf16.mxu0 %v2251_v18  ;;  %2146 = vmatpush3.bf16.msra.mxu1 %v2271_v53  ;;  %v3483_v18 = vld [vmem:[#allocation5_spill] sm:$0xff] }
 0x723   : > { %2147 = vmatprep.subr.bf16.mxu1 %v2272_v17  ;;  %v2125_v17 = vld [vmem:[%s3434_s7] ss:$0 sm:$0xff] }
 0x725   : > { %1728 = vmatpush1.bf16.msra.mxu0 %v2249_v20  ;;  %v3484_v20 = vsub.s32 0, %v3483_v18 }
 0x726   : > { %1729 = vmatprep.subr.bf16.mxu0 %v2254_v21  ;;  %2148 = vmatpush3.bf16.msra.mxu1 %v2273_v0 }
 0x727   : > { %2149 = vmatprep.subr.bf16.mxu1 %v2274_v60  ;;  %v1638_v21 = vrot.slane %v1633_v15, %v3484_v20 }
 0x729   : > { %1730 = vmatpush1.bf16.msra.mxu0 %v2252_v22  ;;  %v3485_v22 = vsub.s32 1, %v3483_v18 }
 0x72a   : > { %1731 = vmatprep.subr.bf16.mxu0 %v2257_v28  ;;  %2150 = vmatpush3.bf16.msra.mxu1 %v2275_v62 }
 0x72b   : > { %2151 = vmatprep.subr.bf16.mxu1 %v2276_v37  ;;  %v1642_v28 = vrot.slane %v1633_v15, %v3485_v22 }
 0x72d   : > { %1732 = vmatpush1.bf16.msra.mxu0 %v2255_v23 }
 0x72e   : > { %1733 = vmatprep.subr.bf16.mxu0 %v2260_v29  ;;  %2152 = vmatpush3.bf16.msra.mxu1 %v2277_v40 }
 0x72f   : > { %2153 = vmatprep.subr.bf16.mxu1 %v2278_v41 }
 0x731   : > { %1734 = vmatpush1.bf16.msra.mxu0 %v2258_v24 }
 0x732   : > { %1735 = vmatprep.subr.bf16.mxu0 %v2263_v54  ;;  %2154 = vmatpush3.bf16.msra.mxu1 %v2279_v42 }
 0x733   : > { %2155 = vmatprep.subr.bf16.mxu1 %v2280_v44 }
 0x735   : > { %1736 = vmatpush1.bf16.msra.mxu0 %v2261_v25 }
 0x736   : > { %1737 = vmatprep.subr.bf16.mxu0 %v2266_v16  ;;  %2156 = vmatpush3.bf16.msra.mxu1 %v2281_v4 }
 0x737   : > { %2157 = vmatprep.subr.bf16.mxu1 %v2282_v47 }
 0x739   : > { %1738 = vmatpush1.bf16.msra.mxu0 %v2264_v51 }
 0x73a   : > { %1739 = vmatprep.subr.bf16.mxu0 %v2269_v8  ;;  %2158 = vmatpush3.bf16.msra.mxu1 %v2283_v48 }
 0x73d   : > { %1740 = vmatpush1.bf16.msra.mxu0 %v2267_v27 }
 0x7e0   : > { %v1540_v61 = vpop.f32.mrf.mxu0  ;;  %v1581_v52 = vpop.f32.mrf.mxu1 }
 0x7e1   : > { %v1588_v43 = vadd.f32 %v1540_v61, %v3481_v2  ;;  %v1590_v7 = vadd.f32 %v1581_v52, %v3482_v50 }
 0x7e2   : > { %v1542_v5 = vpop.f32.mrf.mxu0  ;;  %v1583_v38 = vpop.f32.mrf.mxu1 }
 0x7e3   : > { %v2106_v63 = vmul.f32 -1.442695, %v1588_v43  ;;  %v1589_v6 = vadd.f32 %v1542_v5, %v2933_v58  ;;  %v1591_v3 = vadd.f32 %v1583_v38, %v2936_v49 }
 0x7e4   : > { %v1544_v10 = vpop.f32.mrf.mxu0  ;;  %v1585_v11 = vpop.f32.mrf.mxu1 }
 0x7e5   : > { %2398 = vpow2.f32 %v2106_v63  ;;  %v2107_v12 = vmul.f32 -1.442695, %v1589_v6  ;;  %v2108_v56 = vmul.f32 -1.442695, %v1591_v3 }
 0x7e6   : > { %v1545_v13 = vpop.f32.mrf.mxu0  ;;  %v1586_v31 = vpop.f32.mrf.mxu1 }
 0x7e7   : > { %2400 = vpow2.f32 %v2107_v12 }
 0x7e8   : > { %2402 = vtanh.f32 %v1590_v7 }
 0x7e9   : > { %2404 = vpow2.f32 %v2108_v56 }
 0x7f2   : > { %v2399_v57 = vpop.eup %2398 }
 0x7f3   : > { %v1595_v1 = vadd.f32 1.0, %v2399_v57 }
 0x7f4   : > { %v2401_v26 = vpop.eup %2400 }
 0x7f5   : > { %2406 = vrcp.f32 %v1595_v1  ;;  %v1601_v55 = vadd.f32 1.0, %v2401_v26  ;;  %v2403_v58 = vpop.eup %2402 }
 0x7f6   : > { %v2405_v39 = vpop.eup %2404 }
 0x7f7   : > { %2408 = vrcp.f32 %v1601_v55  ;;  %v1608_v32 = vadd.f32 1.0, %v2405_v39 }
 0x7f9   : > { %2410 = vrcp.f32 %v1608_v32 }
 0x802   : > { %v2407_v19 = vpop.eup %2406 }
 0x803   : > { %v1612_v59 = vmul.f32 %v2407_v19, %v2403_v58 }
 0x804   : > { %v2409_v30 = vpop.eup %2408 }
 0x805   : > { %v1611_v33 = vmul.f32 %v2409_v30, %v3353_v36  ;;  %v2284_v36 = vld [vmem:[%s3433_s6 + $0x40] sm:$0xff]  }
 0x806   : > { %v2411_v34 = vpop.eup %2410  ;;  %2159 = vmatprep.subr.bf16.mxu1 %v2284_v36 }
 0x807   : > { %v1613_v49 = vadd.f32 %v1612_v59, %v1611_v33  ;;  %2160 = vmatpush3.bf16.msra.mxu1 %v2285_v14 }
 0x809   : > { %2412 = vtanh.f32 %v1613_v49 }
 0x816   : > { %v2413_v35 = vpop.eup %2412 }
 0x817   : > { %v1615_v45 = vmul.f32 %v2413_v35, %v2411_v34 }
 0x819   : > { %v1616_v46 = vpack.c.bf16 %v1615_v45, %v1615_v45 }
 0x81b   : > { %1758 = vmatmul.mubr.bf16.vlgmr.msra.gmra.mxu0 %v1616_v46 }
 0x8db   : > { %v1759_v23 = vpop.f32.mrf.mxu0 }
 0x8dc   : > { %v1760_v29 = vadd.f32 %v1759_v23, %v1638_v21 }
 0x8dd   : > { %v1761_v24 = vpop.f32.mrf.mxu0 }
 0x8de   : > { %v1762_v54 = vadd.f32 %v1761_v24, %v1642_v28  ;;  %v1766_v25 = vmax.f32 %v1760_v29, 0.0 }
 0x8df   : > { %v1763_v16 = vpop.f32.mrf.mxu0 }
 0x8e0   : > { %v1767_v51 = vmax.f32 %v1762_v54, 0.0  ;;  %v1768_v9 = vpack.c.bf16 %v1766_v25, %v1766_v25 }
 0x8e1   : > { %v1764_v8 = vpop.f32.mrf.mxu0 }
 0x8e2   : > { %v1769_v27 = vpack.c.bf16 %v1767_v51, %v1767_v51 }
 0x8e4   : > { %1937 = vmatprep.mubr.bf16.mxu1 %v1769_v27 }
 0x8e5   : > { %1938 = vmatmul.mubr.bf16.vlgmr.msra.gmra.mxu1 %v1768_v9 }
 0x9a5   : > { %v2161_v53 = vpop.f32.mrf.mxu1 }
 0x9a7   : > { %v2162_v0 = vpop.f32.mrf.mxu1 }
 0x9a8   : > { %v2163_v60 = vadd.f32 %v2162_v0, %v2161_v53 }
 0x9a9   : > { %v2164_v62 = vpop.f32.mrf.mxu1 }
 0x9aa   : > { %v1940_v37 = vadd.f32 %v2163_v60, %v2125_v17 }
 0x9ab   : > { %v2165_v40 = vpop.f32.mrf.mxu1 }
 0x9ac   : > { %1957 = vperm.xlu1 %2190, %v1940_v37   ;;  %1946 = vrot.lane.b32.xlu0 %v1940_v37, %s2488_s15 }
 0xa1e   : > { %v1947_v41 = vpop.permute.xlu0 %1946 }
 0xa1f   : > { %v1950_v42 = vsel %vm1949_vm1, %v1947_v41, 0.0 }
 0xa20   : > { %1951 = vadd.xlane.f32.xlu0 %v1950_v42 }
 0xa27   : > { %v1958_v52 = vpop.permute.xlu1 %1957 }
 0xaa9   : > { %v1952_v44 = vpop.xlane.xlu0 %1951 }
 0xaaa   : > { %v1954_v4 = vmul.f32 0.125, %v1952_v44 }
 0xaac   : > { %v1955_v61 = vsub.f32 %v1940_v37, %v1954_v4 }
 0xaae   : > { %v1960_v2 = vadd.f32 %v1958_v52, %v1955_v61 }
 0xab0   : > { %1962 = vrot.lane.b32.xlu1 %v1960_v2, %s2488_s15 }
 0xb22   : > { %v1963_v43 = vpop.permute.xlu1 %1962 }
 0xb23   : > { %1965 = vst.msk [vmem:[%s318_s20] sm:$0xff] %vm1949_vm1, %v1963_v43 }
 0xb24 PF: > { %s19_s27 = sadd.s32 1, %s2482_s27  }
 0xb25   : > { %p16_p1 = scmp.ge.s32.totalorder %s19_s27, 4  }
 0xb27   :  { %18 = sbr.rel (!%p16_p1) target bundleno = 1 (0x1), region = 87 }
 0xb2c   :  { %1985 = vsyncpa [#allocation3], 1 }
 0xb2d   :  { %1987 = vsyncpa [#allocation3 + $0x1], 1 }

</bundles_post_ra>
